<compile_context>
chip_gen: v7x
topology: tpu7x:2x2x1
jax: 0.10.0
libtpu: 0.0.40
codegen_flags: <defaults>
</compile_context>

<pallas_src>
import jax
import jax.numpy as jnp
from jax.experimental import pallas as pl
from jax.experimental.pallas import tpu as pltpu

# ---------------- configuration (small shapes consistent with the module) ----
BATCH = 2
SEQ_LEN = 16
EMB_DIM = 32            # emb_dim
DOMAIN_EMB_DIM = 32     # domain_emb_dim
HIDDEN_DIM = 32         # hidden_dims = [32]
EXPERT_NUM = 5
DOMAIN_NUM = 4
KERNEL_SIZES = (1, 2, 3, 5, 10)
FEATS_PER_KERNEL = 8    # feature_kernel = {1:8, 2:8, 3:8, 5:8, 10:8}

K_MAX = max(KERNEL_SIZES)
N_KERNELS = len(KERNEL_SIZES)
MLP_INPUT = FEATS_PER_KERNEL * N_KERNELS                # 40 (classifier input)
FUSED_FEATS = EXPERT_NUM * MLP_INPUT                    # 200 (all experts, lane-dense)
FUSED_PAD = 256                                         # padded to 2 full lane tiles
WIN_DIM = K_MAX * EMB_DIM                               # 320 (im2col K dimension)


# ------------------------------- Pallas kernel -------------------------------
def mdfend_kernel(feat_ref, mask_ref, dom_ref,
                  att_ref, gate_wb1_ref, gate_wb2_ref,
                  conv_w_ref, conv_bm_ref, gate_exp_ref,
                  cls_wb1_ref, cls_wb2_ref,
                  out_ref):
    E = EMB_DIM
    De = DOMAIN_EMB_DIM
    H = HIDDEN_DIM

    fp = feat_ref[...]                          # (TB, L+K_MAX-1, E), zero padded
    TB = fp.shape[0]
    L = mask_ref.shape[-1]
    mask = mask_ref[...][:, 0, :]               # (TB, L)
    x = fp[:, :L, :]                            # original feature (TB, L, E)

    # -------- MaskAttention: Linear(E,1) -> masked softmax over L -> pool ----
    att = att_ref[...]                          # (1, E+1): lanes 0..E-1 = w, lane E = b
    scores = jnp.sum(x * att[:, :E][None, :, :], axis=-1) + att[:, E:]      # (TB, L)
    scores = jnp.where(mask == 0.0, -1e30, scores)   # finite: safe if a row is fully padded
    m = jnp.max(scores, axis=-1, keepdims=True)
    p = jnp.exp(scores - m)
    p = p / jnp.sum(p, axis=-1, keepdims=True)       # (TB, L)
    att_feat = jnp.sum(p[:, :, None] * x, axis=1)    # (TB, E)

    # -------- Gate MLP (split matmul avoids an in-kernel concat) -> softmax --
    dom = dom_ref[...][:, 0, :]                 # (TB, De)
    gw1 = gate_wb1_ref[...]                     # (E+De+1, H), last row = bias
    h = (jnp.dot(att_feat, gw1[:E], preferred_element_type=jnp.float32)
         + jnp.dot(dom, gw1[E:E + De], preferred_element_type=jnp.float32)
         + gw1[E + De:])
    h = jnp.maximum(h, 0.0)
    gw2 = gate_wb2_ref[...]                     # (H+1, n_exp), last row = bias
    logits = jnp.dot(h, gw2[:H], preferred_element_type=jnp.float32) + gw2[H:]
    gm = jnp.max(logits, axis=1, keepdims=True)
    gp = jnp.exp(logits - gm)
    gate = gp / jnp.sum(gp, axis=1, keepdims=True)   # (TB, n_exp)

    # -------- Fused conv bank: im2col built in-kernel, ONE 2D MXU matmul -----
    # wins[b, l, t*E+d] = feature[b, l+t, d] (zero past the end, via padded tile)
    wins = jnp.concatenate([fp[:, t:t + L, :] for t in range(K_MAX)], axis=-1)  # (TB, L, 320)
    wins2d = wins.reshape(TB * L, WIN_DIM)
    conv = jnp.dot(wins2d, conv_w_ref[...],
                   preferred_element_type=jnp.float32)               # (TB*L, 256)
    # bias + per-kernel-size time-validity mask (-1e30 on invalid positions,
    # 0 on the 56 zero-padded columns)
    conv = conv.reshape(TB, L, FUSED_PAD) + conv_bm_ref[...][None, :, :]
    pooled = jnp.max(conv, axis=1)                                   # (TB, 256) global max pool

    # -------- Gated mixture, lane-dense (no concat, no expert loop) ----------
    gate_full = jnp.dot(gate, gate_exp_ref[...],
                        preferred_element_type=jnp.float32)          # (TB, 256)
    mixed = pooled * gate_full                                       # (TB, 256)

    # -------- Classifier MLP (expert-sum folded into 5x-tiled W1) + sigmoid --
    cw1 = cls_wb1_ref[...]                      # (256+1, H), last row = bias
    hc = jnp.dot(mixed, cw1[:FUSED_PAD],
                 preferred_element_type=jnp.float32) + cw1[FUSED_PAD:]
    hc = jnp.maximum(hc, 0.0)
    cw2 = cls_wb2_ref[...]                      # (H+1, 1), last row = bias
    logit = jnp.dot(hc, cw2[:H], preferred_element_type=jnp.float32) + cw2[H:]
    out_ref[...] = (1.0 / (1.0 + jnp.exp(-logit))).reshape(TB, 1, 1)


# ------------------------- wrapper-side packing (jit-fused) -------------------
def _pack_params(params, seq_len):
    f32 = jnp.float32
    pad_cols = FUSED_PAD - FUSED_FEATS

    # attention weight + bias packed into one lane-oriented (1, E+1) row
    att_wb = jnp.concatenate([params['att_w'], params['att_b']],
                             axis=0).astype(f32).reshape(1, EMB_DIM + 1)
    # gate MLP (biases as last rows)
    gate_wb1 = jnp.concatenate([params['gate_w1'], params['gate_b1']], axis=0).astype(f32)
    gate_wb2 = jnp.concatenate([params['gate_w2'], params['gate_b2']], axis=0).astype(f32)

    # conv bank packed to (K_MAX*E, 256); col = e*(n_k*C) + ki*C + c, cols 200..255 = 0
    padded = []
    for ki, k in enumerate(KERNEL_SIZES):
        w = params['conv_w'][ki]                                   # (n_exp, k, E, C)
        padded.append(jnp.pad(w, ((0, 0), (0, K_MAX - k), (0, 0), (0, 0))))
    wall = jnp.stack(padded, axis=1)                               # (n_exp, n_k, K_MAX, E, C)
    wall = wall.transpose(2, 3, 0, 1, 4)                           # (K_MAX, E, n_exp, n_k, C)
    conv_w = wall.reshape(WIN_DIM, FUSED_FEATS).astype(f32)        # (320, 200)
    conv_w = jnp.pad(conv_w, ((0, 0), (0, pad_cols)))              # (320, 256)

    # bias + time-validity mask folded into one additive (L, 256) slab
    # (-1e30 on invalid positions, 0 on the padded columns)
    bias = jnp.stack(params['conv_b'], axis=1).reshape(1, FUSED_FEATS)       # (1, 200)
    l_idx = jnp.arange(seq_len)[:, None]                                     # (L, 1)
    valid_len = seq_len - jnp.array(KERNEL_SIZES) + 1                        # (n_k,)
    valid = l_idx < valid_len[None, :]                                       # (L, n_k)
    valid = jnp.repeat(valid, FEATS_PER_KERNEL, axis=1)                      # (L, n_k*C)
    valid = jnp.tile(valid, (1, EXPERT_NUM))                                 # (L, 200)
    conv_bm = jnp.where(valid, bias, -1e30).astype(f32)
    conv_bm = jnp.pad(conv_bm, ((0, 0), (0, pad_cols)))                      # (L, 256)

    # expand gate (B,5) -> (B,256) with a one-hot block matrix (padded cols = 0)
    gate_expand = jnp.repeat(jnp.eye(EXPERT_NUM, dtype=f32),
                             N_KERNELS * FEATS_PER_KERNEL, axis=1)           # (5, 200)
    gate_expand = jnp.pad(gate_expand, ((0, 0), (0, pad_cols)))              # (5, 256)

    # classifier: tile W1 so sum-over-experts folds into the matmul (padded rows = 0)
    cls_w1_tiled = jnp.tile(params['cls_w1'], (EXPERT_NUM, 1))               # (200, H)
    cls_w1_tiled = jnp.pad(cls_w1_tiled, ((0, pad_cols), (0, 0)))            # (256, H)
    cls_wb1 = jnp.concatenate([cls_w1_tiled, params['cls_b1']], axis=0).astype(f32)
    cls_wb2 = jnp.concatenate([params['cls_w2'], params['cls_b2']], axis=0).astype(f32)
    return att_wb, gate_wb1, gate_wb2, conv_w, conv_bm, gate_expand, cls_wb1, cls_wb2


@jax.jit
def mdfend_forward(feature, mask, domain_emb, params):
    B, L, _ = feature.shape
    assert L >= K_MAX, "seq_len must be >= largest conv kernel size"
    # zero-pad time axis so the kernel can build all K_MAX taps in VMEM
    feat_pad = jnp.pad(feature, ((0, 0), (0, K_MAX - 1), (0, 0)))            # (B, L+9, E)
    mask3 = mask.reshape(B, 1, L)
    dom3 = domain_emb.reshape(B, 1, DOMAIN_EMB_DIM)
    (att_wb, gate_wb1, gate_wb2, conv_w, conv_bm,
     gate_expand, cls_wb1, cls_wb2) = _pack_params(params, L)

    # batch grid: >=2 steps whenever B>=2 (lets v7x use both TensorCores);
    # weights stay VMEM-resident via index_map -> 0.
    TB = 1 if B <= 1 else min(128, pl.cdiv(B, 2))
    grid = (pl.cdiv(B, TB),)
    L_pad = L + K_MAX - 1

    def wfull(arr):
        return pl.BlockSpec(arr.shape, lambda i, _nd=arr.ndim: (0,) * _nd)

    in_specs = [
        pl.BlockSpec((TB, L_pad, EMB_DIM), lambda i: (i, 0, 0)),    # padded feature
        pl.BlockSpec((TB, 1, L), lambda i: (i, 0, 0)),              # mask
        pl.BlockSpec((TB, 1, DOMAIN_EMB_DIM), lambda i: (i, 0, 0)), # domain embedding
        wfull(att_wb), wfull(gate_wb1), wfull(gate_wb2),
        wfull(conv_w), wfull(conv_bm), wfull(gate_expand),
        wfull(cls_wb1), wfull(cls_wb2),
    ]
    out_spec = pl.BlockSpec((TB, 1, 1), lambda i: (i, 0, 0))

    out = pl.pallas_call(
        mdfend_kernel,
        out_shape=jax.ShapeDtypeStruct((B, 1, 1), jnp.float32),
        grid=grid,
        in_specs=in_specs,
        out_specs=out_spec,
        compiler_params=pltpu.CompilerParams(
            dimension_semantics=("parallel",)),
    )(feat_pad, mask3, dom3, att_wb, gate_wb1, gate_wb2,
      conv_w, conv_bm, gate_expand, cls_wb1, cls_wb2)
    return out.reshape(B, 1)


# ------------------------------- pure-JAX reference ---------------------------
def mdfend_reference(feature, mask, domain_emb, params):
    scores = feature @ params['att_w'][:, 0] + params['att_b'][0, 0]
    scores = jnp.where(mask == 0.0, -jnp.inf, scores)
    p = jax.nn.softmax(scores, axis=-1)
    att_feat = jnp.einsum('bl,ble->be', p, feature)

    gate_in = jnp.concatenate([att_feat, domain_emb], axis=1)
    h = jnp.maximum(gate_in @ params['gate_w1'] + params['gate_b1'], 0.0)
    gate = jax.nn.softmax(h @ params['gate_w2'] + params['gate_b2'], axis=1)

    L = feature.shape[1]
    shared = 0.0
    for e in range(EXPERT_NUM):
        feats = []
        for ki, k in enumerate(KERNEL_SIZES):
            w = params['conv_w'][ki][e]   # (k, E, Cout)
            b = params['conv_b'][ki][e]   # (Cout,)
            l_out = L - k + 1
            acc = sum(jnp.einsum('ble,ec->blc', feature[:, t:t + l_out, :], w[t])
                      for t in range(k)) + b
            feats.append(jnp.max(acc, axis=1))
        expert_feat = jnp.concatenate(feats, axis=1)
        shared = shared + expert_feat * gate[:, e:e + 1]

    hc = jnp.maximum(shared @ params['cls_w1'] + params['cls_b1'], 0.0)
    return jax.nn.sigmoid(hc @ params['cls_w2'] + params['cls_b2'])


# ------------------------------- parameter init --------------------------------
def init_params(key):
    ks = iter(jax.random.split(key, 64))
    f32 = jnp.float32

    def rnd(shape, scale=0.1):
        return (scale * jax.random.normal(next(ks), shape)).astype(f32)

    params = {
        'att_w': rnd((EMB_DIM, 1)),
        'att_b': rnd((1, 1)),
        'gate_w1': rnd((EMB_DIM + DOMAIN_EMB_DIM, HIDDEN_DIM)),
        'gate_b1': rnd((1, HIDDEN_DIM)),
        'gate_w2': rnd((HIDDEN_DIM, EXPERT_NUM)),
        'gate_b2': rnd((1, EXPERT_NUM)),
        'conv_w': [rnd((EXPERT_NUM, k, EMB_DIM, FEATS_PER_KERNEL)) for k in KERNEL_SIZES],
        'conv_b': [rnd((EXPERT_NUM, FEATS_PER_KERNEL)) for _ in KERNEL_SIZES],
        'cls_w1': rnd((MLP_INPUT, HIDDEN_DIM)),
        'cls_b1': rnd((1, HIDDEN_DIM)),
        'cls_w2': rnd((HIDDEN_DIM, 1)),
        'cls_b2': rnd((1, 1)),
        'emb_table': rnd((DOMAIN_NUM, DOMAIN_EMB_DIM)),
    }
    return params


if __name__ == "__main__":
    key = jax.random.PRNGKey(0)
    k_feat, k_param = jax.random.split(key)

    params = init_params(k_param)

    feature = jax.random.normal(k_feat, (BATCH, SEQ_LEN, EMB_DIM), dtype=jnp.float32)
    # valid lengths: first sample uses full seq, second is padded after 10 tokens
    lengths = jnp.array([SEQ_LEN, 10], dtype=jnp.int32)
    mask = (jnp.arange(SEQ_LEN)[None, :] < lengths[:, None]).astype(jnp.float32)
    category = jnp.array([1, 3], dtype=jnp.int32)

    # embedding lookup (gather) done as JAX glue outside the kernel
    domain_emb = params['emb_table'][category]            # (B, DOMAIN_EMB_DIM)

    out = mdfend_forward(feature, mask, domain_emb, params)
    out = jax.block_until_ready(out)

    ref = mdfend_reference(feature, mask, domain_emb, params)
    assert out.shape == (BATCH, 1)
    assert bool(jnp.all(jnp.isfinite(out)))
    assert jnp.allclose(out, ref, rtol=1e-3, atol=1e-4), (out, ref)

    print("KERNEL_OK")
</pallas_src>

<mosaic_0001>
module attributes {stable_mosaic.version = 11 : i64} {
  func.func @mdfend_kernel(%arg0: i32, %arg1: memref<1x25x32xf32, #tpu.memory_space<vmem>>, %arg2: memref<1x1x16xf32, #tpu.memory_space<vmem>>, %arg3: memref<1x1x32xf32, #tpu.memory_space<vmem>>, %arg4: memref<1x33xf32, #tpu.memory_space<vmem>>, %arg5: memref<65x32xf32, #tpu.memory_space<vmem>>, %arg6: memref<33x5xf32, #tpu.memory_space<vmem>>, %arg7: memref<320x256xf32, #tpu.memory_space<vmem>>, %arg8: memref<16x256xf32, #tpu.memory_space<vmem>>, %arg9: memref<5x256xf32, #tpu.memory_space<vmem>>, %arg10: memref<257x32xf32, #tpu.memory_space<vmem>>, %arg11: memref<33x1xf32, #tpu.memory_space<vmem>>, %arg12: memref<1x1x1xf32, #tpu.memory_space<vmem>>) attributes {dimension_semantics = [#tpu.dimension_semantics<parallel>], iteration_bounds = array<i64: 2>, scalar_prefetch = 0 : i64, scratch_operands = 0 : i64, tpu.core_type = #tpu.core_type<tc>, window_params = [{transform_indices = @transform_0, window_bounds = array<i64: 1, 25, 32>}, {transform_indices = @transform_1, window_bounds = array<i64: 1, 1, 16>}, {transform_indices = @transform_2, window_bounds = array<i64: 1, 1, 32>}, {pipeline_mode = #tpu.pipeline_mode<synchronous>, transform_indices = @transform_3, window_bounds = array<i64: 1, 33>}, {pipeline_mode = #tpu.pipeline_mode<synchronous>, transform_indices = @transform_4, window_bounds = array<i64: 65, 32>}, {pipeline_mode = #tpu.pipeline_mode<synchronous>, transform_indices = @transform_5, window_bounds = array<i64: 33, 5>}, {pipeline_mode = #tpu.pipeline_mode<synchronous>, transform_indices = @transform_6, window_bounds = array<i64: 320, 256>}, {pipeline_mode = #tpu.pipeline_mode<synchronous>, transform_indices = @transform_7, window_bounds = array<i64: 16, 256>}, {pipeline_mode = #tpu.pipeline_mode<synchronous>, transform_indices = @transform_8, window_bounds = array<i64: 5, 256>}, {pipeline_mode = #tpu.pipeline_mode<synchronous>, transform_indices = @transform_9, window_bounds = array<i64: 257, 32>}, {pipeline_mode = #tpu.pipeline_mode<synchronous>, transform_indices = @transform_10, window_bounds = array<i64: 33, 1>}, {transform_indices = @transform_11, window_bounds = array<i64: 1, 1, 1>}]} {
    %c0 = arith.constant 0 : index
    %c0_0 = arith.constant 0 : index
    %c0_1 = arith.constant 0 : index
    %0 = vector.load %arg1[%c0, %c0_0, %c0_1] : memref<1x25x32xf32, #tpu.memory_space<vmem>>, vector<1x25x32xf32>
    %c0_2 = arith.constant 0 : index
    %c0_3 = arith.constant 0 : index
    %c0_4 = arith.constant 0 : index
    %1 = vector.load %arg2[%c0_2, %c0_3, %c0_4] : memref<1x1x16xf32, #tpu.memory_space<vmem>>, vector<1x1x16xf32>
    %2 = vector.shape_cast %1 : vector<1x1x16xf32> to vector<1x16xf32>
    %3 = vector.extract_strided_slice %0 {offsets = [0, 0, 0], sizes = [1, 16, 32], strides = [1, 1, 1]} : vector<1x25x32xf32> to vector<1x16x32xf32>
    %c0_5 = arith.constant 0 : index
    %c0_6 = arith.constant 0 : index
    %4 = vector.load %arg4[%c0_5, %c0_6] : memref<1x33xf32, #tpu.memory_space<vmem>>, vector<1x33xf32>
    %5 = vector.extract_strided_slice %4 {offsets = [0, 0], sizes = [1, 32], strides = [1, 1]} : vector<1x33xf32> to vector<1x32xf32>
    %6 = vector.shape_cast %5 : vector<1x32xf32> to vector<1x1x32xf32>
    %7 = vector.broadcast %6 : vector<1x1x32xf32> to vector<1x16x32xf32>
    %8 = arith.mulf %3, %7 : vector<1x16x32xf32>
    %cst = arith.constant dense<0.000000e+00> : vector<1x16xf32>
    %9 = vector.multi_reduction <add>, %8, %cst [2] : vector<1x16x32xf32> to vector<1x16xf32>
    %10 = vector.extract_strided_slice %4 {offsets = [0, 32], sizes = [1, 1], strides = [1, 1]} : vector<1x33xf32> to vector<1x1xf32>
    %11 = vector.broadcast %10 : vector<1x1xf32> to vector<1x16xf32>
    %12 = arith.addf %9, %11 : vector<1x16xf32>
    %cst_7 = arith.constant 0.000000e+00 : f32
    %13 = vector.broadcast %cst_7 : f32 to vector<1x16xf32>
    %14 = arith.cmpf oeq, %2, %13 : vector<1x16xf32>
    %cst_8 = arith.constant -1.000000e+30 : f32
    %15 = vector.broadcast %cst_8 : f32 to vector<1x16xf32>
    %16 = arith.select %14, %15, %12 : vector<1x16xi1>, vector<1x16xf32>
    %cst_9 = arith.constant dense<0xFF800000> : vector<1xf32>
    %17 = vector.multi_reduction <maximumf>, %16, %cst_9 [1] : vector<1x16xf32> to vector<1xf32>
    %18 = vector.shape_cast %17 : vector<1xf32> to vector<1x1xf32>
    %19 = vector.broadcast %18 : vector<1x1xf32> to vector<1x16xf32>
    %20 = arith.subf %16, %19 : vector<1x16xf32>
    %21 = math.exp %20 : vector<1x16xf32>
    %cst_10 = arith.constant dense<0.000000e+00> : vector<1xf32>
    %22 = vector.multi_reduction <add>, %21, %cst_10 [1] : vector<1x16xf32> to vector<1xf32>
    %23 = vector.shape_cast %22 : vector<1xf32> to vector<1x1xf32>
    %24 = vector.broadcast %23 : vector<1x1xf32> to vector<1x16xf32>
    %25 = arith.divf %21, %24 : vector<1x16xf32>
    %26 = vector.shape_cast %25 : vector<1x16xf32> to vector<1x16x1xf32>
    %27 = vector.broadcast %26 : vector<1x16x1xf32> to vector<1x16x32xf32>
    %28 = arith.mulf %27, %3 : vector<1x16x32xf32>
    %cst_11 = arith.constant dense<0.000000e+00> : vector<1x32xf32>
    %29 = vector.multi_reduction <add>, %28, %cst_11 [1] : vector<1x16x32xf32> to vector<1x32xf32>
    %c0_12 = arith.constant 0 : index
    %c0_13 = arith.constant 0 : index
    %c0_14 = arith.constant 0 : index
    %30 = vector.load %arg3[%c0_12, %c0_13, %c0_14] : memref<1x1x32xf32, #tpu.memory_space<vmem>>, vector<1x1x32xf32>
    %31 = vector.shape_cast %30 : vector<1x1x32xf32> to vector<1x32xf32>
    %c0_15 = arith.constant 0 : index
    %c0_16 = arith.constant 0 : index
    %32 = vector.load %arg5[%c0_15, %c0_16] : memref<65x32xf32, #tpu.memory_space<vmem>>, vector<65x32xf32>
    %33 = vector.extract_strided_slice %32 {offsets = [0, 0], sizes = [32, 32], strides = [1, 1]} : vector<65x32xf32> to vector<32x32xf32>
    %cst_17 = arith.constant dense<0.000000e+00> : vector<1x32xf32>
    %34 = tpu.matmul %29, %33, %cst_17 {dimension_numbers = #tpu.dot_dimension_numbers<[1], [0], [0], [1], [0, 0, 1, 1], [], []>} : vector<1x32xf32>, vector<32x32xf32>, vector<1x32xf32> -> vector<1x32xf32>
    %35 = vector.extract_strided_slice %32 {offsets = [32, 0], sizes = [32, 32], strides = [1, 1]} : vector<65x32xf32> to vector<32x32xf32>
    %cst_18 = arith.constant dense<0.000000e+00> : vector<1x32xf32>
    %36 = tpu.matmul %31, %35, %cst_18 {dimension_numbers = #tpu.dot_dimension_numbers<[1], [0], [0], [1], [0, 0, 1, 1], [], []>} : vector<1x32xf32>, vector<32x32xf32>, vector<1x32xf32> -> vector<1x32xf32>
    %37 = arith.addf %34, %36 : vector<1x32xf32>
    %38 = vector.extract_strided_slice %32 {offsets = [64, 0], sizes = [1, 32], strides = [1, 1]} : vector<65x32xf32> to vector<1x32xf32>
    %39 = arith.addf %37, %38 : vector<1x32xf32>
    %cst_19 = arith.constant 0.000000e+00 : f32
    %40 = vector.broadcast %cst_19 : f32 to vector<1x32xf32>
    %41 = arith.maximumf %39, %40 : vector<1x32xf32>
    %c0_20 = arith.constant 0 : index
    %c0_21 = arith.constant 0 : index
    %42 = vector.load %arg6[%c0_20, %c0_21] : memref<33x5xf32, #tpu.memory_space<vmem>>, vector<33x5xf32>
    %43 = vector.extract_strided_slice %42 {offsets = [0, 0], sizes = [32, 5], strides = [1, 1]} : vector<33x5xf32> to vector<32x5xf32>
    %cst_22 = arith.constant dense<0.000000e+00> : vector<1x5xf32>
    %44 = tpu.matmul %41, %43, %cst_22 {dimension_numbers = #tpu.dot_dimension_numbers<[1], [0], [0], [1], [0, 0, 1, 1], [], []>} : vector<1x32xf32>, vector<32x5xf32>, vector<1x5xf32> -> vector<1x5xf32>
    %45 = vector.extract_strided_slice %42 {offsets = [32, 0], sizes = [1, 5], strides = [1, 1]} : vector<33x5xf32> to vector<1x5xf32>
    %46 = arith.addf %44, %45 : vector<1x5xf32>
    %cst_23 = arith.constant dense<0xFF800000> : vector<1xf32>
    %47 = vector.multi_reduction <maximumf>, %46, %cst_23 [1] : vector<1x5xf32> to vector<1xf32>
    %48 = vector.shape_cast %47 : vector<1xf32> to vector<1x1xf32>
    %49 = vector.broadcast %48 : vector<1x1xf32> to vector<1x5xf32>
    %50 = arith.subf %46, %49 : vector<1x5xf32>
    %51 = math.exp %50 : vector<1x5xf32>
    %cst_24 = arith.constant dense<0.000000e+00> : vector<1xf32>
    %52 = vector.multi_reduction <add>, %51, %cst_24 [1] : vector<1x5xf32> to vector<1xf32>
    %53 = vector.shape_cast %52 : vector<1xf32> to vector<1x1xf32>
    %54 = vector.broadcast %53 : vector<1x1xf32> to vector<1x5xf32>
    %55 = arith.divf %51, %54 : vector<1x5xf32>
    %56 = vector.extract_strided_slice %0 {offsets = [0, 0, 0], sizes = [1, 16, 32], strides = [1, 1, 1]} : vector<1x25x32xf32> to vector<1x16x32xf32>
    %57 = vector.extract_strided_slice %0 {offsets = [0, 1, 0], sizes = [1, 16, 32], strides = [1, 1, 1]} : vector<1x25x32xf32> to vector<1x16x32xf32>
    %58 = vector.extract_strided_slice %0 {offsets = [0, 2, 0], sizes = [1, 16, 32], strides = [1, 1, 1]} : vector<1x25x32xf32> to vector<1x16x32xf32>
    %59 = vector.extract_strided_slice %0 {offsets = [0, 3, 0], sizes = [1, 16, 32], strides = [1, 1, 1]} : vector<1x25x32xf32> to vector<1x16x32xf32>
    %60 = vector.extract_strided_slice %0 {offsets = [0, 4, 0], sizes = [1, 16, 32], strides = [1, 1, 1]} : vector<1x25x32xf32> to vector<1x16x32xf32>
    %61 = vector.extract_strided_slice %0 {offsets = [0, 5, 0], sizes = [1, 16, 32], strides = [1, 1, 1]} : vector<1x25x32xf32> to vector<1x16x32xf32>
    %62 = vector.extract_strided_slice %0 {offsets = [0, 6, 0], sizes = [1, 16, 32], strides = [1, 1, 1]} : vector<1x25x32xf32> to vector<1x16x32xf32>
    %63 = vector.extract_strided_slice %0 {offsets = [0, 7, 0], sizes = [1, 16, 32], strides = [1, 1, 1]} : vector<1x25x32xf32> to vector<1x16x32xf32>
    %64 = vector.extract_strided_slice %0 {offsets = [0, 8, 0], sizes = [1, 16, 32], strides = [1, 1, 1]} : vector<1x25x32xf32> to vector<1x16x32xf32>
    %65 = vector.extract_strided_slice %0 {offsets = [0, 9, 0], sizes = [1, 16, 32], strides = [1, 1, 1]} : vector<1x25x32xf32> to vector<1x16x32xf32>
    %66 = tpu.concatenate %56, %57, %58, %59, %60, %61, %62, %63, %64, %65 in 2 : vector<1x16x32xf32>, vector<1x16x32xf32>, vector<1x16x32xf32>, vector<1x16x32xf32>, vector<1x16x32xf32>, vector<1x16x32xf32>, vector<1x16x32xf32>, vector<1x16x32xf32>, vector<1x16x32xf32>, vector<1x16x32xf32> -> vector<1x16x320xf32>
    %67 = vector.shape_cast %66 : vector<1x16x320xf32> to vector<16x320xf32>
    %c0_25 = arith.constant 0 : index
    %c0_26 = arith.constant 0 : index
    %68 = vector.load %arg7[%c0_25, %c0_26] : memref<320x256xf32, #tpu.memory_space<vmem>>, vector<320x256xf32>
    %cst_27 = arith.constant dense<0.000000e+00> : vector<16x256xf32>
    %69 = tpu.matmul %67, %68, %cst_27 {dimension_numbers = #tpu.dot_dimension_numbers<[1], [0], [0], [1], [0, 0, 1, 1], [], []>} : vector<16x320xf32>, vector<320x256xf32>, vector<16x256xf32> -> vector<16x256xf32>
    %70 = vector.shape_cast %69 : vector<16x256xf32> to vector<1x16x256xf32>
    %c0_28 = arith.constant 0 : index
    %c0_29 = arith.constant 0 : index
    %71 = vector.load %arg8[%c0_28, %c0_29] : memref<16x256xf32, #tpu.memory_space<vmem>>, vector<16x256xf32>
    %72 = vector.shape_cast %71 : vector<16x256xf32> to vector<1x16x256xf32>
    %73 = arith.addf %70, %72 : vector<1x16x256xf32>
    %cst_30 = arith.constant dense<0xFF800000> : vector<1x256xf32>
    %74 = vector.multi_reduction <maximumf>, %73, %cst_30 [1] : vector<1x16x256xf32> to vector<1x256xf32>
    %c0_31 = arith.constant 0 : index
    %c0_32 = arith.constant 0 : index
    %75 = vector.load %arg9[%c0_31, %c0_32] : memref<5x256xf32, #tpu.memory_space<vmem>>, vector<5x256xf32>
    %cst_33 = arith.constant dense<0.000000e+00> : vector<1x256xf32>
    %76 = tpu.matmul %55, %75, %cst_33 {dimension_numbers = #tpu.dot_dimension_numbers<[1], [0], [0], [1], [0, 0, 1, 1], [], []>} : vector<1x5xf32>, vector<5x256xf32>, vector<1x256xf32> -> vector<1x256xf32>
    %77 = arith.mulf %74, %76 : vector<1x256xf32>
    %c0_34 = arith.constant 0 : index
    %c0_35 = arith.constant 0 : index
    %78 = vector.load %arg10[%c0_34, %c0_35] : memref<257x32xf32, #tpu.memory_space<vmem>>, vector<257x32xf32>
    %79 = vector.extract_strided_slice %78 {offsets = [0, 0], sizes = [256, 32], strides = [1, 1]} : vector<257x32xf32> to vector<256x32xf32>
    %cst_36 = arith.constant dense<0.000000e+00> : vector<1x32xf32>
    %80 = tpu.matmul %77, %79, %cst_36 {dimension_numbers = #tpu.dot_dimension_numbers<[1], [0], [0], [1], [0, 0, 1, 1], [], []>} : vector<1x256xf32>, vector<256x32xf32>, vector<1x32xf32> -> vector<1x32xf32>
    %81 = vector.extract_strided_slice %78 {offsets = [256, 0], sizes = [1, 32], strides = [1, 1]} : vector<257x32xf32> to vector<1x32xf32>
    %82 = arith.addf %80, %81 : vector<1x32xf32>
    %cst_37 = arith.constant 0.000000e+00 : f32
    %83 = vector.broadcast %cst_37 : f32 to vector<1x32xf32>
    %84 = arith.maximumf %82, %83 : vector<1x32xf32>
    %c0_38 = arith.constant 0 : index
    %c0_39 = arith.constant 0 : index
    %85 = vector.load %arg11[%c0_38, %c0_39] : memref<33x1xf32, #tpu.memory_space<vmem>>, vector<33x1xf32>
    %86 = vector.extract_strided_slice %85 {offsets = [0, 0], sizes = [32, 1], strides = [1, 1]} : vector<33x1xf32> to vector<32x1xf32>
    %cst_40 = arith.constant dense<0.000000e+00> : vector<1x1xf32>
    %87 = tpu.matmul %84, %86, %cst_40 {dimension_numbers = #tpu.dot_dimension_numbers<[1], [0], [0], [1], [0, 0, 1, 1], [], []>} : vector<1x32xf32>, vector<32x1xf32>, vector<1x1xf32> -> vector<1x1xf32>
    %88 = vector.extract_strided_slice %85 {offsets = [32, 0], sizes = [1, 1], strides = [1, 1]} : vector<33x1xf32> to vector<1x1xf32>
    %89 = arith.addf %87, %88 : vector<1x1xf32>
    %cst_41 = arith.constant 0.000000e+00 : f32
    %90 = vector.broadcast %cst_41 : f32 to vector<1x1xf32>
    %91 = arith.subf %90, %89 : vector<1x1xf32>
    %92 = math.exp %91 : vector<1x1xf32>
    %cst_42 = arith.constant 1.000000e+00 : f32
    %93 = vector.broadcast %cst_42 : f32 to vector<1x1xf32>
    %94 = arith.addf %93, %92 : vector<1x1xf32>
    %cst_43 = arith.constant 1.000000e+00 : f32
    %95 = vector.broadcast %cst_43 : f32 to vector<1x1xf32>
    %96 = arith.divf %95, %94 : vector<1x1xf32>
    %97 = vector.shape_cast %96 : vector<1x1xf32> to vector<1x1x1xf32>
    %c0_44 = arith.constant 0 : index
    %c0_45 = arith.constant 0 : index
    %c0_46 = arith.constant 0 : index
    %98 = vector.load %arg12[%c0_44, %c0_45, %c0_46] : memref<1x1x1xf32, #tpu.memory_space<vmem>>, vector<1x1x1xf32>
    tpu.vector_store %arg12[%c0_44, %c0_45, %c0_46], %97 {strides = array<i32>} : memref<1x1x1xf32, #tpu.memory_space<vmem>>, vector<1x1x1xf32>,
    return
  }
  func.func @transform_0(%arg0: i32) -> (i32, i32, i32) {
    %c0_i32 = arith.constant 0 : i32
    %c0_i32_0 = arith.constant 0 : i32
    %c0_i32_1 = arith.constant 0 : i32
    return %arg0, %c0_i32, %c0_i32_0 : i32, i32, i32
  }
  func.func @transform_1(%arg0: i32) -> (i32, i32, i32) {
    %c0_i32 = arith.constant 0 : i32
    %c0_i32_0 = arith.constant 0 : i32
    %c0_i32_1 = arith.constant 0 : i32
    return %arg0, %c0_i32, %c0_i32_0 : i32, i32, i32
  }
  func.func @transform_2(%arg0: i32) -> (i32, i32, i32) {
    %c0_i32 = arith.constant 0 : i32
    %c0_i32_0 = arith.constant 0 : i32
    %c0_i32_1 = arith.constant 0 : i32
    return %arg0, %c0_i32, %c0_i32_0 : i32, i32, i32
  }
  func.func @transform_3(%arg0: i32) -> (i32, i32) {
    %c0_i32 = arith.constant 0 : i32
    %c0_i32_0 = arith.constant 0 : i32
    %c0_i32_1 = arith.constant 0 : i32
    return %c0_i32, %c0_i32_0 : i32, i32
  }
  func.func @transform_4(%arg0: i32) -> (i32, i32) {
    %c0_i32 = arith.constant 0 : i32
    %c0_i32_0 = arith.constant 0 : i32
    %c0_i32_1 = arith.constant 0 : i32
    return %c0_i32, %c0_i32_0 : i32, i32
  }
  func.func @transform_5(%arg0: i32) -> (i32, i32) {
    %c0_i32 = arith.constant 0 : i32
    %c0_i32_0 = arith.constant 0 : i32
    %c0_i32_1 = arith.constant 0 : i32
    return %c0_i32, %c0_i32_0 : i32, i32
  }
  func.func @transform_6(%arg0: i32) -> (i32, i32) {
    %c0_i32 = arith.constant 0 : i32
    %c0_i32_0 = arith.constant 0 : i32
    %c0_i32_1 = arith.constant 0 : i32
    return %c0_i32, %c0_i32_0 : i32, i32
  }
  func.func @transform_7(%arg0: i32) -> (i32, i32) {
    %c0_i32 = arith.constant 0 : i32
    %c0_i32_0 = arith.constant 0 : i32
    %c0_i32_1 = arith.constant 0 : i32
    return %c0_i32, %c0_i32_0 : i32, i32
  }
  func.func @transform_8(%arg0: i32) -> (i32, i32) {
    %c0_i32 = arith.constant 0 : i32
    %c0_i32_0 = arith.constant 0 : i32
    %c0_i32_1 = arith.constant 0 : i32
    return %c0_i32, %c0_i32_0 : i32, i32
  }
  func.func @transform_9(%arg0: i32) -> (i32, i32) {
    %c0_i32 = arith.constant 0 : i32
    %c0_i32_0 = arith.constant 0 : i32
    %c0_i32_1 = arith.constant 0 : i32
    return %c0_i32, %c0_i32_0 : i32, i32
  }
  func.func @transform_10(%arg0: i32) -> (i32, i32) {
    %c0_i32 = arith.constant 0 : i32
    %c0_i32_0 = arith.constant 0 : i32
    %c0_i32_1 = arith.constant 0 : i32
    return %c0_i32, %c0_i32_0 : i32, i32
  }
  func.func @transform_11(%arg0: i32) -> (i32, i32, i32) {
    %c0_i32 = arith.constant 0 : i32
    %c0_i32_0 = arith.constant 0 : i32
    %c0_i32_1 = arith.constant 0 : i32
    return %arg0, %c0_i32, %c0_i32_0 : i32, i32, i32
  }
}

</mosaic_0001>

<bundles_post_ra>
// kernel: tile.12
= control target key start
LH: loop header
LB: loop body
LE: loop exit
PB: predicated region body
PF: predicated region fallthrough
CT: control target
= control target key end

     0   :  { %vm259_vm0 = vcmask 1047556   ;;  %vm284_vm1 = vcmask 64512   ;;  %vm261_vm2 = vcmask 326656   ;;  %s451_s16 = smov 80   ;;  %s452_s17 = smov 120   ;;  %vm288_vm3 = vcmask 261120   ;;  %s510_s0 = inlined_call_operand.vmem [shape: pred[16,5,40], index: 0, kind: input, shape index: {}]   ;;  %s511_s1 = inlined_call_operand.vmem [shape: pred[16,200], index: 1, kind: output, shape index: {}]  }
   0x1   :  { %v435_v0 = vld [vmem:[%s510_s0 + $0xa] sm:$0xff]   ;;  %v438_v1 = vld [vmem:[%s510_s0 + $0x2] sm:$0xff]   ;;  %v251_v2 = vld [vmem:[%s510_s0] ss:$18 sps:$2 sm:$0xf]   ;;  %s453_s18 = smov 32  }
   0x2   :  { %v143_v3 = vunpack.c.2.s8 %v435_v0  ;;  %v159_v4 = vunpack.c.1.s8 %v435_v0  ;;  %v175_v5 = vunpack.c.0.s8 %v435_v0  ;;  %v191_v6 = vunpack.c.3.s8 %v438_v1  ;;  %v427_v7 = vld [vmem:[%s510_s0 + $0x18] sm:$0xff]   ;;  %v431_v8 = vld [vmem:[%s510_s0 + $0x14] sm:$0xf]   ;;  %s450_s0 = smov 40  }
   0x3   :  { %v207_v9 = vunpack.c.2.s8 %v438_v1  ;;  %v223_v10 = vunpack.c.1.s8 %v438_v1  ;;  %v238_v11 = vunpack.c.0.s8 %v438_v1  ;;  %v252_v12 = vunpack.c.0.s8 %v251_v2 }
   0x4   :  { %148 = vst [vmem:[#allocation1 + $0x38] sm:$0xff] %v143_v3  ;;  %164 = vst [vmem:[#allocation1 + $0x30] sm:$0xff] %v159_v4  ;;  %v15_v13 = vunpack.c.3.s8 %v427_v7  ;;  %v31_v14 = vunpack.c.2.s8 %v427_v7  ;;  %v47_v15 = vunpack.c.1.s8 %v427_v7  ;;  %v63_v16 = vunpack.c.0.s8 %v427_v7 }
   0x5   :  { %180 = vst [vmem:[#allocation1 + $0x28] sm:$0xff] %v175_v5  ;;  %196 = vst [vmem:[#allocation1 + $0x20] sm:$0xff] %v191_v6  ;;  %v79_v17 = vunpack.c.1.s8 %v431_v8  ;;  %v95_v18 = vunpack.c.0.s8 %v431_v8  ;;  %v111_v19 = vunpack.c.1.s8 %v251_v2  ;;  %v127_v20 = vunpack.c.3.s8 %v435_v0 }
   0x6   :  { %212 = vst [vmem:[#allocation1 + $0x18] sm:$0xff] %v207_v9  ;;  %228 = vst [vmem:[#allocation1 + $0x10] sm:$0xff] %v223_v10  ;;  %vm291_vm4 = vcmask 1048512   ;;  %vm323_vm5 = vcmask 982656   ;;  %vm344_vm6 = vcmask 654656   ;;  %vm365_vm7 = vcmask 589056  }
   0x7   :  { %243 = vst [vmem:[#allocation1 + $0x8] sm:$0xff] %v238_v11  ;;  %256 = vst [vmem:[#allocation1] sm:$0xff] %v252_v12  ;;  %v454_v4 = vmov 0  }
   0x8   :  { %20 = vst [vmem:[#allocation1 + $0x78] sm:$0xff] %v15_v13  ;;  %36 = vst [vmem:[#allocation1 + $0x70] sm:$0xff] %v31_v14 }
   0x9   :  { %52 = vst [vmem:[#allocation1 + $0x68] sm:$0xff] %v47_v15  ;;  %68 = vst [vmem:[#allocation1 + $0x60] sm:$0xff] %v63_v16 }
   0xa   :  { %84 = vst [vmem:[#allocation1 + $0x58] sm:$0xff] %v79_v17  ;;  %100 = vst [vmem:[#allocation1 + $0x50] sm:$0xff] %v95_v18 }
   0xb   :  { %116 = vst [vmem:[#allocation1 + $0x48] sm:$0xff] %v111_v19  ;;  %132 = vst [vmem:[#allocation1 + $0x40] sm:$0xff] %v127_v20 }
   0xc   :  { %v339_v21 = vld [vmem:[#allocation1 + $0x1] ss:$8 sm:$0xf0]   ;;  %v318_v22 = vld [vmem:[#allocation1 + $0x2] ss:$8 sm:$0xf0]  }
   0xd   :  { %v275_v28 = vld [vmem:[#allocation1 + $0x3] ss:$8 sm:$0xf0]   ;;  %v360_v50 = vld [vmem:[#allocation1 + $0x4] ss:$8 sm:$0xf0]  }
   0xe   :  { %v337_v23 = vld [vmem:[#allocation1 + $0x1] ss:$8 sm:$0xf]   ;;  %v316_v24 = vld [vmem:[#allocation1 + $0x2] ss:$8 sm:$0xf]  }
   0xf   :  { %v341_v25 = vsel %vm259_vm0, %v339_v21, %v337_v23  ;;  %v320_v26 = vsel %vm259_vm0, %v318_v22, %v316_v24  ;;  %v273_v27 = vld [vmem:[#allocation1 + $0x3] ss:$8 sm:$0xf]   ;;  %v358_v49 = vld [vmem:[#allocation1 + $0x4] ss:$8 sm:$0xf]  }
  0x10   :  { %342 = vrot.lane.b32.xlu0 %v341_v25, %s450_s0  ;;  %321 = vrot.lane.b32.xlu1 %v320_v26, %s451_s16  ;;  %v277_v29 = vsel %vm259_vm0, %v275_v28, %v273_v27  ;;  %v279_v30 = vld [vmem:[#allocation1 + $0x3] ss:$8 sm:$0xf]   ;;  %v328_v34 = vld [vmem:[#allocation1 + $0x42] ss:$8 sm:$0xf0]   ;;  %v362_v57 = vsel %vm259_vm0, %v360_v50, %v358_v49 }
  0x11   :  { %v281_v31 = vld [vmem:[#allocation1 + $0x3] ss:$8 sm:$0xf0]   ;;  %v349_v38 = vld [vmem:[#allocation1 + $0x41] ss:$8 sm:$0xf0]  }
  0x12   :  { %v283_v32 = vsel %vm259_vm0, %v281_v31, %v279_v30  ;;  %v326_v33 = vld [vmem:[#allocation1 + $0x42] ss:$8 sm:$0xf]   ;;  %v347_v37 = vld [vmem:[#allocation1 + $0x41] ss:$8 sm:$0xf]  }
  0x13   :  { %v285_v35 = vsel %vm284_vm1, %v283_v32, %v277_v29  ;;  %v330_v36 = vsel %vm259_vm0, %v328_v34, %v326_v33  ;;  %v294_v39 = vld [vmem:[#allocation1 + $0x43] ss:$8 sm:$0xf]   ;;  %v351_v44 = vsel %vm259_vm0, %v349_v38, %v347_v37  ;;  %v369_v46 = vld [vmem:[#allocation1 + $0x44] ss:$8 sm:$0xf]  }
  0x14   :  { %v296_v40 = vld [vmem:[#allocation1 + $0x43] ss:$8 sm:$0xf0]   ;;  %286 = vrot.lane.b32.xlu0 %v285_v35, %s452_s17  ;;  %331 = vrot.lane.b32.xlu1 %v330_v36, %s451_s16  ;;  %v371_v47 = vld [vmem:[#allocation1 + $0x44] ss:$8 sm:$0xf0]  }
  0x15   :  { %v298_v41 = vsel %vm259_vm0, %v296_v40, %v294_v39  ;;  %v300_v42 = vld [vmem:[#allocation1 + $0x43] ss:$8 sm:$0xf]   ;;  %v257_v51 = vld [vmem:[#allocation1] ss:$8 sm:$0xf]   ;;  %v373_v56 = vsel %vm259_vm0, %v371_v47, %v369_v46 }
  0x16   :  { %v302_v43 = vld [vmem:[#allocation1 + $0x43] ss:$8 sm:$0xf0]   ;;  %v258_v52 = vld [vmem:[#allocation1] ss:$8 sm:$0xf0]  }
  0x17   :  { %v304_v45 = vsel %vm259_vm0, %v302_v43, %v300_v42  ;;  %v260_v53 = vsel %vm259_vm0, %v258_v52, %v257_v51  ;;  %v264_v54 = vld [vmem:[#allocation1 + $0x40] ss:$8 sm:$0xf]  }
  0x18   :  { %v306_v48 = vsel %vm284_vm1, %v304_v45, %v298_v41  ;;  %352 = vrot.lane.b32.xlu1 %v351_v44, %s450_s0  ;;  %v266_v55 = vld [vmem:[#allocation1 + $0x40] ss:$8 sm:$0xf0]   ;;  %262 = vst.msk [vmem:[#allocation0] sm:$0xff] %vm261_vm2, %v260_v53  }
  0x19   :  { %307 = vrot.lane.b32.xlu0 %v306_v48, %s452_s17  ;;  %v268_v58 = vsel %vm259_vm0, %v266_v55, %v264_v54 }
  0x1a   :  { %271 = vst.msk [vmem:[#allocation0 + $0x10] sm:$0xff] %vm261_vm2, %v268_v58  }
  0x1c   :  { %374 = vrot.lane.b32.xlu1 %v373_v56, %s453_s18 }
  0x1d   :  { %363 = vrot.lane.b32.xlu0 %v362_v57, %s453_s18 }
  0x82   :  { %v343_v59 = vpop.permute.xlu0 %342   ;;  %v322_v60 = vpop.permute.xlu1 %321  }
  0x86   :  { %v287_v61 = vpop.permute.xlu0 %286   ;;  %v332_v62 = vpop.permute.xlu1 %331  }
  0x87   :  { %290 = vst.msk [vmem:[#allocation0 + $0x8] sm:$0xff] %vm288_vm3, %v287_v61  }
  0x88   :  { %292 = vst.msk [vmem:[#allocation0] sm:$0xff] %vm291_vm4, %v287_v61  }
  0x89   :  { %324 = vst.msk [vmem:[#allocation0] sm:$0xff] %vm323_vm5, %v322_v60  }
  0x8a   :  { %345 = vst.msk [vmem:[#allocation0] sm:$0xff] %vm344_vm6, %v343_v59   ;;  %v353_v63 = vpop.permute.xlu1 %352  }
  0x8b   :  { %v308_v0 = vpop.permute.xlu0 %307  }
  0x8c   :  { %311 = vst.msk [vmem:[#allocation0 + $0x18] sm:$0xff] %vm288_vm3, %v308_v0  }
  0x8d   :  { %314 = vst.msk [vmem:[#allocation0 + $0x10] sm:$0xff] %vm291_vm4, %v308_v0  }
  0x8e   :  { %335 = vst.msk [vmem:[#allocation0 + $0x10] sm:$0xff] %vm323_vm5, %v332_v62   ;;  %v375_v1 = vpop.permute.xlu1 %374  }
  0x8f   :  { %356 = vst.msk [vmem:[#allocation0 + $0x10] sm:$0xff] %vm344_vm6, %v353_v63   ;;  %v364_v2 = vpop.permute.xlu0 %363  }
  0x90   :  { %378 = vst.msk [vmem:[#allocation0 + $0x18] sm:$0xff] %vm365_vm7, %v375_v1   ;;  %367 = vst.msk [vmem:[#allocation0 + $0x8] sm:$0xff] %vm365_vm7, %v364_v2  }
  0x91   :  { %v383_v3 = vld [vmem:[#allocation0] sm:$0xff] }
  0x92   :  { %v385_v5 = vpack.c.b16 %v454_v4, %v383_v3 }
  0x94   :  { %v386_v6 = vpack.c.b8 %v454_v4, %v385_v5 }
  0x96   :  { %v396_v7 = vld [vmem:[#allocation0 + $0x10] sm:$0xff]  ;;  %387 = vst [vmem:[%s511_s1] sm:$0x3] %v386_v6 }
  0x97   :  { %v400_v8 = vpack.c.b16 %v454_v4, %v396_v7  ;;  %v404_v9 = vld [vmem:[#allocation0 + $0x18] sm:$0xff]  ;;  %v389_v10 = vld [vmem:[#allocation0 + $0x8] sm:$0xff] }
  0x98   :  { %v408_v11 = vpack.c.b16 %v454_v4, %v404_v9  ;;  %v392_v12 = vpack.c.b16 %v454_v4, %v389_v10 }
  0x99   :  { %v401_v13 = vpack.c.b8 %v454_v4, %v400_v8 }
  0x9a   :  { %v409_v14 = vpack.c.b8 %v454_v4, %v408_v11  ;;  %v393_v15 = vpack.c.b8 %v454_v4, %v392_v12 }
  0x9b   :  { %443 = vst [vmem:[%s511_s1 + $0x4] sm:$0x3] %v401_v13 }
  0x9c   :  { %444 = vst [vmem:[%s511_s1 + $0x6] sm:$0x3] %v409_v14  ;;  %442 = vst [vmem:[%s511_s1 + $0x2] sm:$0x3] %v393_v15 }

// kernel: mdfend_forward.1
= control target key start
LH: loop header
LB: loop body
LE: loop exit
PB: predicated region body
PF: predicated region fallthrough
CT: control target
= control target key end

     0   :  { %s2022_s17 = smov 0   ;;  %s2601_s0 = inlined_call_operand.vmem [shape: f32[2,25,32], index: 0, kind: input, shape index: {}]   ;;  %s2602_s1 = inlined_call_operand.vmem [shape: f32[2,1,16], index: 1, kind: input, shape index: {}]   ;;  %s2603_s2 = inlined_call_operand.vmem [shape: f32[2,1,32], index: 2, kind: input, shape index: {}]   ;;  %s2604_s3 = inlined_call_operand.vmem [shape: f32[1,33], index: 3, kind: input, shape index: {}]   ;;  %s2605_s4 = inlined_call_operand.vmem [shape: f32[65,32], index: 4, kind: input, shape index: {}]   ;;  %s2606_s5 = inlined_call_operand.vmem [shape: f32[33,5], index: 5, kind: input, shape index: {}]   ;;  %s2607_s6 = inlined_call_operand.vmem [shape: f32[320,256], index: 6, kind: input, shape index: {}]   ;;  %s2608_s7 = inlined_call_operand.vmem [shape: f32[16,256], index: 7, kind: input, shape index: {}]   ;;  %s2609_s8 = inlined_call_operand.vmem [shape: f32[5,256], index: 8, kind: input, shape index: {}]   ;;  %s2610_s9 = inlined_call_operand.vmem [shape: f32[257,32], index: 9, kind: input, shape index: {}]   ;;  %s2611_s10 = inlined_call_operand.vmem [shape: f32[33,1], index: 10, kind: input, shape index: {}]   ;;  %s2612_s11 = inlined_call_operand.vmem [shape: f32[2,1,1], index: 11, kind: output, shape index: {}]  }
   0x1 LB: > { %s1630_s18 = sadd.s32 4294967295, %s1951_s17   ;;  %p1634_p0 = scmp.ge.s32.totalorder %s1951_s17, 1  ;;  %s1951_s17 = sphi %s2022_s17, %s21_s17  }
   0x2   : > { %p353_p1 = scmp.lt.s32.totalorder %s1951_s17, 3 }
   0x4   : > { %p354_p2 = pnand %p1634_p0, %p353_p1 }
   0x5   : > { %p397_p3 = scmp.lt.s32.totalorder (!%p354_p2), %s1630_s18, 1  ;;  %v418_v0 = vlaneseq (!%p354_p2)  ;;  %v416_v1 = vld [vmem:[%s2604_s3] sm:$0x1] (!%p354_p2)  ;;  %v1953_v2 = vmov (!%p354_p2), 32   ;;  %vm425_vm0 = vcmask (!%p354_p2), 261120   ;;  %v1954_v12 = vmov (!%p354_p2), 0  }
   0x6   : > { %357 = sbr.rel (%p354_p2) target bundleno = 2201 (0x899), region = 64  ;;  %1905 = vset.pattern.permute.xlu1 (!%p354_p2), %v1953_v2  ;;  %1907 = vset.pattern.permute.xlu0 (!%p354_p2), %v1954_v12  ;;  %v1955_v14 = vmov (!%p354_p2), 1966171168   ;;  %vm624_vm1 = vcmask (!%p354_p2), 130112   ;;  %vm642_vm3 = vcmask (!%p354_p2), 122880   ;;  %vm1957_vm4 = vmmov (!%p354_p2), 0  }
   0x7   : > { %v2036_v3 = vshrl.u32 (!%p354_p2), %v418_v0, 7  ;;  %433 = vperm.xlu1 (!%p354_p2), %1905, %v416_v1   ;;  %v514_v15 = vunpack.c.l.s4 (!%p354_p2), %v1955_v14  ;;  %vm939_vm5 = vcmask (!%p354_p2), 1045504   ;;  %vm983_vm6 = vcmask (!%p354_p2), 1041408   ;;  %s1959_s25 = smov (!%p354_p2), 64   ;;  %s1960_s28 = smov (!%p354_p2), 32  }
   0x8   : > { %vm912_vm7 = vcmask (!%p354_p2), 32768   ;;  %vm927_vm8 = vcmask (!%p354_p2), 1046528   ;;  %vm971_vm9 = vcmask (!%p354_p2), 1042432   ;;  %vm951_vm10 = vcmask (!%p354_p2), 1044480   ;;  %s1961_s29 = smov (!%p354_p2), 96  }
   0x9   : > { %v2040_v4 = vsub.s32 (!%p354_p2), 0, %v2036_v3  ;;  %v515_v17 = vunpack.c.0.s8 (!%p354_p2), %v514_v15  ;;  %v451_v18 = vsub.s32 (!%p354_p2), 1, %v2036_v3  ;;  %v455_v19 = vsub.s32 (!%p354_p2), 2, %v2036_v3 }
   0xa   : > { %v459_v20 = vsub.s32 (!%p354_p2), 3, %v2036_v3  ;;  %v463_v22 = vsub.s32 (!%p354_p2), 4, %v2036_v3  ;;  %v467_v23 = vsub.s32 (!%p354_p2), 5, %v2036_v3  ;;  %v471_v24 = vsub.s32 (!%p354_p2), 6, %v2036_v3 }
   0xb   : > { %v421_v6 = vrot.slane (!%p354_p2), %v416_v1, %v2040_v4  ;;  %1906 = vset.pattern.permute.xlu1 (!%p354_p2), %v1954_v12  ;;  %v475_v25 = vsub.s32 (!%p354_p2), 7, %v2036_v3  ;;  %v518_v27 = vsub.s32 (!%p354_p2), %v515_v17, %v2036_v3  ;;  %vm995_vm11 = vcmask (!%p354_p2), 1040384  }
   0xc   : > { %vm963_vm12 = vcmask (!%p354_p2), 1043456   ;;  %vm1015_vm13 = vcmask (!%p354_p2), 523264   ;;  %vm1018_vm14 = vcmask (!%p354_p2), 785408   ;;  %vm1292_vm15 = vcmask (!%p354_p2), 39936  }
   0xd   : > { %s2614_s18 = smov (!%p397_p3, %s1630_s18), 1 }
   0xe   : > { %s1648_s21 = sshll.u32 %s2614_s18, 5  ;;  %s404_s27 = scalar_lea.vmem %s2602_s1, %s2614_s18 }
   0xf   : > { %s2045_s24 = scalar_lea.vmem %s2601_s0, %s1648_s21  ;;  %s407_s30 = scalar_lea.vmem %s2603_s2, %s2614_s18 }
  0x10   : > { %v2048_v5 = vld [vmem:[%s2045_s24] sm:$0xff]  ;;  %v2052_v7 = vld [vmem:[%s2045_s24 + $0x8] sm:$0xff]  ;;  %s410_s12 = scalar_lea.vmem %s2612_s11, %s2614_s18 }
  0x11   : > { %v423_v8 = vmul.f32 %v421_v6, %v2048_v5  ;;  %v424_v9 = vmul.f32 %v421_v6, %v2052_v7 }
  0x13   : > { %v426_v10 = vsel %vm425_vm0, %v423_v8, 0.0  ;;  %v429_v11 = vsel %vm425_vm0, %v424_v9, 0.0 }
  0x14   : > { %427 = vadd.xlane.f32.xlu0 %v426_v10 }
  0x18   : > { %430 = vadd.xlane.f32.xlu0 %v429_v11 }
  0x86   : > { %v434_v13 = vpop.permute.xlu1 %433 }
  0x87   : > { %v439_v16 = vrot.slane %v434_v13, %v2040_v4  ;;  %v614_v13 = vand.u32 127, %v418_v0 }
  0x89   : > { %v619_v14 = vadd.s32 4294967288, %v614_v13  ;;  %v617_v15 = vsub.s32 %v614_v13, %v2036_v3 }
  0xa1   : > { %v428_v21 = vpop.xlane.xlu0 %427 }
  0xa2   : > { %v440_v26 = vadd.f32 %v439_v16, %v428_v21  ;;  %v415_v21 = vld [vmem:[%s404_s27] sm:$0x1] }
  0xa3   : > { %vm442_vm2 = vcmp.eq.f32.partialorder %v415_v21, 0.0  ;;  %v2145_v21 = vld [vmem:[%s2045_s24 + $0x10] sm:$0xff] }
  0xa4   : > { %v448_v28 = vrot.slane %v440_v26, %v2040_v4  ;;  %v452_v29 = vrot.slane %v440_v26, %v451_v18  ;;  %v456_v30 = vrot.slane %v440_v26, %v455_v19  ;;  %v460_v31 = vrot.slane %v440_v26, %v459_v20 }
  0xa5   : > { %v431_v32 = vpop.xlane.xlu0 %430  ;;  %v464_v33 = vrot.slane %v440_v26, %v463_v22  ;;  %v468_v34 = vrot.slane %v440_v26, %v467_v23  ;;  %v472_v35 = vrot.slane %v440_v26, %v471_v24  ;;  %v476_v36 = vrot.slane %v440_v26, %v475_v25 }
  0xa6   : > { %v441_v37 = vadd.f32 %v439_v16, %v431_v32  ;;  %v509_v38 = vcombine.low %v448_v28, %v452_v29  ;;  %v510_v39 = vcombine.low %v456_v30, %v460_v31  ;;  %v622_v16 = vsub.s32 %v619_v14, %v2036_v3  ;;  %v681_v32 = vld [vmem:[%s2605_s4 + $0x20] sm:$0xff] }
  0xa7   : > { %v511_v40 = vcombine.low %v464_v33, %v468_v34  ;;  %v512_v41 = vcombine.low %v472_v35, %v476_v36  ;;  %v677_v34 = vld [vmem:[%s2605_s4] sm:$0xff]  ;;  %v678_v35 = vld [vmem:[%s2605_s4 + $0x8] sm:$0xff] }
  0xa8   : > { %v519_v42 = vrot.slane %v509_v38, %v518_v27  ;;  %v526_v43 = vrot.slane %v510_v39, %v518_v27  ;;  %v480_v44 = vrot.slane %v441_v37, %v2040_v4  ;;  %v484_v45 = vrot.slane %v441_v37, %v451_v18 }
  0xa9   : > { %v533_v46 = vrot.slane %v511_v40, %v518_v27  ;;  %v540_v47 = vrot.slane %v512_v41, %v518_v27  ;;  %v488_v48 = vrot.slane %v441_v37, %v455_v19  ;;  %v492_v49 = vrot.slane %v441_v37, %v459_v20  ;;  %v683_v40 = vld [vmem:[%s2605_s4 + $0x30] sm:$0xff]  ;;  %v684_v41 = vld [vmem:[%s2605_s4 + $0x38] sm:$0xff] }
  0xaa   : > { %v541_v50 = vcombine.low %v519_v42, %v526_v43  ;;  %v496_v51 = vrot.slane %v441_v37, %v463_v22  ;;  %v500_v52 = vrot.slane %v441_v37, %v467_v23  ;;  %v504_v53 = vrot.slane %v441_v37, %v471_v24 }
  0xab   : > { %v542_v54 = vcombine.low %v533_v46, %v540_v47  ;;  %v508_v55 = vrot.slane %v441_v37, %v475_v25  ;;  %v558_v56 = vcombine.low %v480_v44, %v484_v45  ;;  %v559_v57 = vcombine.low %v488_v48, %v492_v49  ;;  %v679_v44 = vld [vmem:[%s2605_s4 + $0x10] sm:$0xff]  ;;  %v680_v45 = vld [vmem:[%s2605_s4 + $0x18] sm:$0xff] }
  0xac   : > { %v549_v58 = vrot.slane %v541_v50, %v518_v27  ;;  %v560_v59 = vcombine.low %v496_v51, %v500_v52  ;;  %v1956_v37 = vmov 0.0|0.0   ;;  %v1755_v38 = vpack.c.bf16 %v678_v35, %v677_v34 }
  0xad   : > { %v556_v60 = vrot.slane %v542_v54, %v518_v27  ;;  %v561_v61 = vcombine.low %v504_v53, %v508_v55  ;;  %v568_v62 = vrot.slane %v558_v56, %v518_v27  ;;  %v575_v63 = vrot.slane %v559_v57, %v518_v27  ;;  %1748 = vmatprep.subr.bf16.mxu0 %v1956_v37 }
  0xae   : > { %v582_v1 = vrot.slane %v560_v59, %v518_v27  ;;  %1754 = vmatprep.subr.bf16.mxu1 %v1956_v37  ;;  %v1752_v43 = vpack.c.bf16 %v684_v41, %v683_v40  ;;  %v1758_v46 = vpack.c.bf16 %v680_v45, %v679_v44  ;;  %v1958_v47 = vmov 0.0  }
  0xaf   : > { %v557_v2 = vcombine.low %v549_v58, %v556_v60  ;;  %v589_v6 = vrot.slane %v561_v61, %v518_v27  ;;  %v590_v8 = vcombine.low %v568_v62, %v575_v63  ;;  %1756 = vmatpush3.bf16.msra.mxu1 %v1755_v38  ;;  %1712 = vmatprep.mubr.msk.f32.mxu0 %vm1957_vm4, %v1958_v47  ;;  %v834_v61 = vld [vmem:[%s2606_s5] sm:$0xff]  ;;  %v835_v62 = vld [vmem:[%s2606_s5 + $0x8] sm:$0xff]  ;;  %v972_v34 = vrot.slane %v2048_v5, 5 }
  0xb0   : > { %1757 = vmatprep.subr.bf16.mxu1 %v1956_v37  ;;  %1723 = vmatprep.mubr.msk.f32.mxu1 %vm1957_vm4, %v1958_v47  ;;  %v1761_v63 = vpack.c.bf16 %v835_v62, %v834_v61  ;;  %v973_v35 = vrot.slane %v2052_v7, 5  ;;  %v953_v40 = vrot.slane %v2052_v7, 3  ;;  %v996_v41 = vrot.slane %v2048_v5, 7  ;;  %v1035_v61 = vld [vmem:[%s2607_s6 + $0x38] sm:$0xff] }
  0xb1   : > { %608 = vperm.xlu1 %1906, %v557_v2   ;;  %v591_v9 = vcombine.low %v582_v1, %v589_v6  ;;  %v598_v10 = vrot.slane %v590_v8, %v518_v27  ;;  %v836_v6 = vld [vmem:[%s2606_s5 + $0x10] sm:$0xff]  ;;  %v837_v8 = vld [vmem:[%s2606_s5 + $0x18] sm:$0xff] }
  0xb2   : > { %v974_v38 = vsel %vm971_vm9, %v972_v34, %v973_v35 }
  0xb3   : > { %v605_v11 = vrot.slane %v591_v9, %v518_v27  ;;  %1759 = vmatpush3.bf16.msra.mxu1 %v1758_v46  ;;  %v1764_v9 = vpack.c.bf16 %v837_v8, %v836_v6  ;;  %v1037_v6 = vld [vmem:[%s2607_s6 + $0x48] sm:$0xff]  ;;  %v1039_v8 = vld [vmem:[%s2607_s6 + $0x58] sm:$0xff] }
  0xb5   : > { %v606_v12 = vcombine.low %v598_v10, %v605_v11  ;;  %v685_v10 = vld [vmem:[%s2605_s4 + $0x40] sm:$0x1] }
  0xb7   : > { %611 = vperm.xlu0 %1907, %v606_v12  }
 0x130   : > { %v609_v17 = vpop.permute.xlu1 %608 }
 0x131   : > { %v618_v19 = vrot.slane %v609_v17, %v617_v15  ;;  %v941_v17 = vrot.slane %v2052_v7, 2 }
 0x136   : > { %v612_v18 = vpop.permute.xlu0 %611 }
 0x137   : > { %v623_v20 = vrot.slane %v612_v18, %v622_v16  ;;  %v940_v16 = vrot.slane %v2048_v5, 2  ;;  %v984_v18 = vrot.slane %v2048_v5, 6 }
 0x139   : > { %v625_v22 = vsel %vm624_vm1, %v623_v20, %v618_v19  ;;  %v985_v19 = vrot.slane %v2052_v7, 6  ;;  %v942_v20 = vsel %vm939_vm5, %v940_v16, %v941_v17  ;;  %vm1563_vm1 = vcmask 0  }
 0x13a   : > { %v632_v23 = vrot.slane %v625_v22, %v518_v27 }
 0x13b   : > { %v986_v22 = vsel %vm983_vm6, %v984_v18, %v985_v19  ;;  %v1040_v18 = vld [vmem:[%s2607_s6 + $0x60] sm:$0xff] }
 0x13c   : > { %v639_v24 = vrot.slane %v632_v23, %v518_v27  ;;  %v682_v27 = vld [vmem:[%s2605_s4 + $0x28] sm:$0xff]  ;;  %v1913_v23 = vpack.i.bf16 %v942_v20, %v986_v22  ;;  %v1047_v22 = vld [vmem:[%s2607_s6 + $0x98] sm:$0xff] }
 0x13d   : > { %v1749_v33 = vpack.c.bf16 %v682_v27, %v681_v32  ;;  %v928_v27 = vrot.slane %v2048_v5, 1  ;;  %v1045_v20 = vld [vmem:[%s2607_s6 + $0x88] sm:$0xff] }
 0x13e   : > { %v641_v0 = vsel %vm442_vm2, -1e+30, %v639_v24  ;;  %v943_v24 = vrot.slane %v2145_v21, 2 }
 0x13f   : > { %v643_v25 = vsel %vm642_vm3, %v641_v0, -inf  ;;  %1750 = vmatpush3.bf16.msra.mxu0 %v1749_v33  ;;  %v929_v33 = vrot.slane %v2052_v7, 1 }
 0x140   : > { %644 = vmax.xlane.f32.xlu1 %v643_v25  ;;  %1751 = vmatprep.subr.bf16.mxu0 %v1956_v37  ;;  %v944_v25 = vsel %vm939_vm5, %v941_v17, %v943_v24  ;;  %v1782_v24 = vpack.c.bf16 %v1047_v22, %v1045_v20  ;;  %v1107_v20 = vld [vmem:[%s2607_s6 + $0x278] sm:$0xff] }
 0x143   : > { %1753 = vmatpush3.bf16.msra.mxu0 %v1752_v43 }
 0x144   : > { %1760 = vmatprep.subr.bf16.mxu0 %v1956_v37 }
 0x1cd   : > { %v645_v26 = vpop.xlane.xlu1 %644 }
 0x1ce   : > { %v646_v3 = vsub.f32 %v641_v0, %v645_v26  ;;  %v987_v0 = vrot.slane %v2145_v21, 6 }
 0x1d0   : > { %v647_v28 = vmul.f32 1.442695, %v646_v3  ;;  %v988_v26 = vsel %vm983_vm6, %v985_v19, %v987_v0  ;;  %v1042_v19 = vld [vmem:[%s2607_s6 + $0x70] sm:$0xff]  ;;  %v1044_v0 = vld [vmem:[%s2607_s6 + $0x80] sm:$0xff] }
 0x1d1   : > { %v1923_v3 = vpack.i.bf16 %v944_v25, %v988_v26  ;;  %v1046_v25 = vld [vmem:[%s2607_s6 + $0x90] sm:$0xff] }
 0x1d2   : > { %1933 = vpow2.f32 %v647_v28  ;;  %v838_v28 = vld [vmem:[%s2606_s5 + $0x20] sm:$0x1]  ;;  %v1784_v26 = vpack.c.bf16 %v1046_v25, %v1044_v0  ;;  %v1106_v0 = vld [vmem:[%s2607_s6 + $0x270] sm:$0xff] }
 0x1dc   : > { %v1934_v29 = vpop.eup %1933 }
 0x1dd   : > { %v649_v30 = vsel %vm642_vm3, %v1934_v29, 0.0 }
 0x1de   : > { %650 = vadd.xlane.f32.xlu1 %v649_v30 }
 0x26b   : > { %v651_v31 = vpop.xlane.xlu1 %650 }
 0x26c   : > { %1935 = vrcp.f32 %v651_v31 }
 0x276   : > { %v1936_v36 = vpop.eup %1935 }
 0x277   : > { %v653_v39 = vmul.f32 %v1936_v36, %v1934_v29  ;;  %v930_v36 = vsel %vm927_vm8, %v928_v27, %v929_v33  ;;  %v1053_v27 = vld [vmem:[%s2607_s6 + $0xc8] sm:$0xff] }
 0x278   : > { %v1908_v43 = vpack.i.bf16 %v930_v36, %v974_v38  ;;  %v1052_v36 = vld [vmem:[%s2607_s6 + $0xc0] sm:$0xff]  ;;  %v1054_v38 = vld [vmem:[%s2607_s6 + $0xd0] sm:$0xff] }
 0x279   : > { %v657_v42 = vrot.slane %v653_v39, %v2040_v4  ;;  %v676_v4 = vld [vmem:[%s407_s30] sm:$0x1]  ;;  %v952_v39 = vrot.slane %v2048_v5, 3 }
 0x27a   : > { %1713 = vmatmul.mubr.msk.f32.vlgmr.msra.gmra.mrb[0].mxu0 %vm425_vm0, %v676_v4  ;;  %v931_v4 = vrot.slane %v2145_v21, 1 }
 0x27b   : > { %663 = vbcast.lane.b32.xlu0 %v657_v42, 264  ;;  %659 = vbcast.lane.b32.xlu1 %v657_v42, 256  ;;  %v997_v42 = vrot.slane %v2052_v7, 7  ;;  %v954_v44 = vsel %vm951_vm10, %v952_v39, %v953_v40  ;;  %v1057_v39 = vld [vmem:[%s2607_s6 + $0xe8] sm:$0xff] }
 0x27c   : > { %1734 = vmatprep.mubr.msk.f32.mxu0 %vm1957_vm4, %v1958_v47  ;;  %1762 = vmatpush3.bf16.msra.mxu0 %v1761_v63 }
 0x27d   : > { %1763 = vmatprep.subr.bf16.mxu0 %v1956_v37  ;;  %v998_v45 = vsel %vm995_vm11, %v996_v41, %v997_v42  ;;  %v1792_v41 = vpack.c.bf16 %v1054_v38, %v1052_v36  ;;  %v1079_v36 = vld [vmem:[%s2607_s6 + $0x198] sm:$0xff] }
 0x27e   : > { %v1918_v46 = vpack.i.bf16 %v954_v44, %v998_v45  ;;  %v1058_v44 = vld [vmem:[%s2607_s6 + $0xf0] sm:$0xff]  ;;  %v1061_v45 = vld [vmem:[%s2607_s6 + $0x108] sm:$0xff] }
 0x27f   : > { %1914 = vrot.lane.b32.xlu1 %v1913_v23, %s1959_s25  ;;  %v1780_v23 = vpack.c.bf16 %v1042_v19, %v1040_v18  ;;  %v1105_v19 = vld [vmem:[%s2607_s6 + $0x268] sm:$0xff] }
 0x280   : > { %1765 = vmatpush3.bf16.msra.mxu0 %v1764_v9 }
 0x283   : > { %1924 = vrot.lane.b32.xlu1 %v1923_v3, %s1959_s25  ;;  %v1049_v3 = vld [vmem:[%s2607_s6 + $0xa8] sm:$0xff] }
 0x2ed   : > { %v664_v48 = vpop.permute.xlu0 %663  ;;  %v660_v49 = vpop.permute.xlu1 %659 }
 0x2ee   : > { %v666_v50 = vmul.f32 %v664_v48, %v2052_v7  ;;  %v665_v51 = vmul.f32 %v660_v49, %v2048_v5  ;;  %v932_v48 = vsel %vm927_vm8, %v929_v33, %v931_v4  ;;  %v975_v49 = vrot.slane %v2145_v21, 5  ;;  %v1055_v33 = vld [vmem:[%s2607_s6 + $0xd8] sm:$0xff] }
 0x2f0   : > { %v668_v52 = vsel %vm425_vm0, %v666_v50, 0.0  ;;  %v667_v53 = vsel %vm425_vm0, %v665_v51, 0.0  ;;  %v955_v50 = vrot.slane %v2145_v21, 3  ;;  %v999_v51 = vrot.slane %v2145_v21, 7 }
 0x2f1   : > { %v669_v54 = vadd.f32 %v668_v52, %v667_v53  ;;  %v1029_v52 = vld [vmem:[%s2607_s6 + $0x8] sm:$0xff]  ;;  %v1031_v53 = vld [vmem:[%s2607_s6 + $0x18] sm:$0xff] }
 0x2f3   : > { %v670_v55 = vrot.slane %v669_v54, 4 }
 0x2f5   : > { %v671_v56 = vadd.f32 %v670_v55, %v669_v54  ;;  %v1028_v54 = vld [vmem:[%s2607_s6] sm:$0xff]  ;;  %v976_v55 = vsel %vm971_vm9, %v973_v35, %v975_v49  ;;  %v1790_v35 = vpack.c.bf16 %v1055_v33, %v1053_v27  ;;  %v1095_v49 = vld [vmem:[%s2607_s6 + $0x218] sm:$0xff] }
 0x2f6   : > { %v1072_v33 = vld [vmem:[%s2607_s6 + $0x160] sm:$0xff] }
 0x2f7   : > { %v672_v57 = vrot.slane %v671_v56, 2 }
 0x2f9   : > { %v673_v58 = vadd.f32 %v672_v57, %v671_v56  ;;  %v956_v56 = vsel %vm951_vm10, %v953_v40, %v955_v50  ;;  %v1000_v57 = vsel %vm995_vm11, %v997_v42, %v999_v51  ;;  %v1059_v40 = vld [vmem:[%s2607_s6 + $0xf8] sm:$0xff] }
 0x2fa   : > { %v1928_v9 = vpack.i.bf16 %v956_v56, %v1000_v57  ;;  %v1794_v42 = vpack.c.bf16 %v1059_v40, %v1057_v39  ;;  %v1062_v56 = vld [vmem:[%s2607_s6 + $0x110] sm:$0xff]  ;;  %v1076_v40 = vld [vmem:[%s2607_s6 + $0x180] sm:$0xff] }
 0x2fb   : > { %v674_v59 = vrot.slane %v673_v58, 1 }
 0x2fd   : > { %v675_v60 = vadd.f32 %v674_v59, %v673_v58  ;;  %v1766_v58 = vpack.c.bf16 %v1031_v53, %v1029_v52  ;;  %v1030_v59 = vld [vmem:[%s2607_s6 + $0x10] sm:$0xff]  ;;  %v1092_v52 = vld [vmem:[%s2607_s6 + $0x200] sm:$0xff] }
 0x2fe   : > { %v1768_v62 = vpack.c.bf16 %v1030_v59, %v1028_v54  ;;  %v1094_v53 = vld [vmem:[%s2607_s6 + $0x210] sm:$0xff]  ;;  %v1065_v59 = vld [vmem:[%s2607_s6 + $0x128] sm:$0xff] }
 0x2ff   : > { %1724 = vmatmul.mubr.msk.f32.vlgmr.msra.gmra.mrb[0].mxu1 %vm425_vm0, %v675_v60  ;;  %v1033_v60 = vld [vmem:[%s2607_s6 + $0x28] sm:$0xff]  ;;  %1767 = vmatprep.subr.bf16.mxu1 %v1766_v58  ;;  %v1832_v57 = vpack.c.bf16 %v1094_v53, %v1092_v52  ;;  %v1084_v53 = vld [vmem:[%s2607_s6 + $0x1c0] sm:$0xff] }
 0x300   : > { %v1770_v63 = vpack.c.bf16 %v1035_v61, %v1033_v60  ;;  %1769 = vmatpush1.bf16.msra.mxu1 %v1768_v62  ;;  %v1097_v58 = vld [vmem:[%s2607_s6 + $0x228] sm:$0xff]  ;;  %v1067_v60 = vld [vmem:[%s2607_s6 + $0x138] sm:$0xff] }
 0x301   : > { %v1099_v61 = vld [vmem:[%s2607_s6 + $0x238] sm:$0xff] }
 0x302   : > { %1771 = vmatprep.subr.bf16.mxu1 %v1770_v63  ;;  %v1834_v62 = vpack.c.bf16 %v1099_v61, %v1097_v58  ;;  %v1096_v63 = vld [vmem:[%s2607_s6 + $0x220] sm:$0xff] }
 0x34d   : > { %v755_v1 = vpop.f32.mrb[0].mxu0 }
 0x34e   : > { %v1714_v2 = vpop.f32.mrb[1].mxu0 }
 0x34f   : > { %v1034_v2 = vld [vmem:[%s2607_s6 + $0x30] sm:$0xff] }
 0x3d2   : > { %v828_v11 = vpop.f32.mrb[0].mxu1 }
 0x3d3   : > { %v829_v12 = vadd.f32 %v828_v11, %v755_v1  ;;  %v1725_v13 = vpop.f32.mrb[1].mxu1  ;;  %v1032_v1 = vld [vmem:[%s2607_s6 + $0x20] sm:$0xff]  ;;  %v1774_v11 = vpack.c.bf16 %v1039_v8, %v1037_v6  ;;  %v1101_v8 = vld [vmem:[%s2607_s6 + $0x248] sm:$0xff] }
 0x3d4   : > { %v1038_v13 = vld [vmem:[%s2607_s6 + $0x50] sm:$0xff] }
 0x3d5   : > { %v832_v14 = vadd.f32 %v829_v12, %v685_v10  ;;  %v1772_v10 = vpack.c.bf16 %v1034_v2, %v1032_v1  ;;  %v1036_v12 = vld [vmem:[%s2607_s6 + $0x40] sm:$0xff]  ;;  %v1098_v1 = vld [vmem:[%s2607_s6 + $0x230] sm:$0xff] }
 0x3d6   : > { %v1776_v16 = vpack.c.bf16 %v1038_v13, %v1036_v12  ;;  %v1836_v6 = vpack.c.bf16 %v1098_v1, %v1096_v63  ;;  %v1066_v12 = vld [vmem:[%s2607_s6 + $0x130] sm:$0xff]  ;;  %v965_v63 = vrot.slane %v2052_v7, 4  ;;  %v964_v1 = vrot.slane %v2048_v5, 4 }
 0x3d7   : > { %v833_v15 = vmax.f32 %v832_v14, 0.0  ;;  %v1041_v14 = vld [vmem:[%s2607_s6 + $0x68] sm:$0xff]  ;;  %1773 = vmatpush1.bf16.msra.mxu1 %v1772_v10  ;;  %v1802_v10 = vpack.c.bf16 %v1067_v60, %v1065_v59  ;;  %v1088_v59 = vld [vmem:[%s2607_s6 + $0x1e0] sm:$0xff]  ;;  %v1090_v60 = vld [vmem:[%s2607_s6 + $0x1f0] sm:$0xff] }
 0x3d8   : > { %1775 = vmatprep.subr.bf16.mxu1 %v1774_v11  ;;  %v1064_v11 = vld [vmem:[%s2607_s6 + $0x120] sm:$0xff]  ;;  %v1828_v61 = vpack.c.bf16 %v1090_v60, %v1088_v59  ;;  %v1378_v59 = vld [vmem:[%s2610_s9 + $0x18] sm:$0xff] }
 0x3d9   : > { %1735 = vmatmul.mubr.msk.f32.vlgmr.msra.gmra.mrb[2].mxu0 %vm425_vm0, %v833_v15  ;;  %v1043_v15 = vld [vmem:[%s2607_s6 + $0x78] sm:$0xff]  ;;  %v1804_v22 = vpack.c.bf16 %v1066_v12, %v1064_v11  ;;  %v966_v12 = vsel %vm963_vm12, %v964_v1, %v965_v63  ;;  %v1395_v60 = vld [vmem:[%s2610_s9 + $0xa0] sm:$0xff] }
 0x3da   : > { %1255 = vmatprep.mubr.f32.mxu0 %v1958_v47  ;;  %v1778_v17 = vpack.c.bf16 %v1043_v15, %v1041_v14  ;;  %v1100_v14 = vld [vmem:[%s2607_s6 + $0x240] sm:$0xff]  ;;  %v1069_v15 = vld [vmem:[%s2607_s6 + $0x148] sm:$0xff] }
 0x3db   : > { %1777 = vmatpush1.bf16.msra.mxu1 %v1776_v16  ;;  %v1071_v16 = vld [vmem:[%s2607_s6 + $0x158] sm:$0xff] }
 0x3dc   : > { %1779 = vmatprep.subr.bf16.mxu1 %v1778_v17  ;;  %v1102_v17 = vld [vmem:[%s2607_s6 + $0x250] sm:$0xff]  ;;  %v1806_v25 = vpack.c.bf16 %v1071_v16, %v1069_v15 }
 0x3dd   : > { %v1840_v18 = vpack.c.bf16 %v1102_v17, %v1100_v14 }
 0x3df   : > { %1781 = vmatpush1.bf16.msra.mxu1 %v1780_v23  ;;  %v1842_v23 = vpack.c.bf16 %v1107_v20, %v1105_v19 }
 0x3e0   : > { %1783 = vmatprep.subr.bf16.mxu1 %v1782_v24  ;;  %v1104_v24 = vld [vmem:[%s2607_s6 + $0x260] sm:$0xff] }
 0x3e3   : > { %1785 = vmatpush1.bf16.msra.mxu1 %v1784_v26  ;;  %v1068_v26 = vld [vmem:[%s2607_s6 + $0x140] sm:$0xff] }
 0x4ac   : > { %v908_v29 = vpop.f32.mrb[2].mxu0 }
 0x4ad   : > { %v2152_v30 = vadd.f32 %v908_v29, %v838_v28  ;;  %v1736_v31 = vpop.f32.mrb[3].mxu0  ;;  %v1051_v28 = vld [vmem:[%s2607_s6 + $0xb8] sm:$0xff]  ;;  %v1048_v29 = vld [vmem:[%s2607_s6 + $0xa0] sm:$0xff] }
 0x4ae   : > { %v1786_v31 = vpack.c.bf16 %v1051_v28, %v1049_v3  ;;  %v1070_v3 = vld [vmem:[%s2607_s6 + $0x150] sm:$0xff]  ;;  %v1073_v28 = vld [vmem:[%s2607_s6 + $0x168] sm:$0xff] }
 0x4af   : > { %v913_v32 = vsel %vm912_vm7, %v2152_v30, -inf }
 0x4b0   : > { %914 = vmax.xlane.f32.xlu0 %v913_v32  ;;  %v1050_v32 = vld [vmem:[%s2607_s6 + $0xb0] sm:$0xff]  ;;  %1787 = vmatprep.subr.bf16.mxu1 %v1786_v31  ;;  %v1844_v31 = vpack.c.bf16 %v1106_v0, %v1104_v24 }
 0x4b1   : > { %v1788_v34 = vpack.c.bf16 %v1050_v32, %v1048_v29  ;;  %v1075_v29 = vld [vmem:[%s2607_s6 + $0x178] sm:$0xff]  ;;  %v1808_v32 = vpack.c.bf16 %v1070_v3, %v1068_v26 }
 0x4b2   : > { %v1810_v27 = vpack.c.bf16 %v1075_v29, %v1073_v28 }
 0x4b3   : > { %1789 = vmatpush1.bf16.msra.mxu1 %v1788_v34  ;;  %v1074_v34 = vld [vmem:[%s2607_s6 + $0x170] sm:$0xff] }
 0x4b4   : > { %1791 = vmatprep.subr.bf16.mxu1 %v1790_v35  ;;  %v1077_v35 = vld [vmem:[%s2607_s6 + $0x188] sm:$0xff]  ;;  %v1812_v38 = vpack.c.bf16 %v1074_v34, %v1072_v33 }
 0x4b5   : > { %v1814_v39 = vpack.c.bf16 %v1079_v36, %v1077_v35 }
 0x4b7   : > { %1793 = vmatpush1.bf16.msra.mxu1 %v1792_v41  ;;  %v1078_v41 = vld [vmem:[%s2607_s6 + $0x190] sm:$0xff] }
 0x4b8   : > { %1795 = vmatprep.subr.bf16.mxu1 %v1794_v42  ;;  %v1081_v42 = vld [vmem:[%s2607_s6 + $0x1a8] sm:$0xff] }
 0x4c6   : > { %1909 = vrot.lane.b32.xlu0 %v1908_v43, %s1960_s28  ;;  %v1056_v43 = vld [vmem:[%s2607_s6 + $0xe0] sm:$0xff] }
 0x4c7   : > { %v1796_v50 = vpack.c.bf16 %v1058_v44, %v1056_v43  ;;  %v1083_v43 = vld [vmem:[%s2607_s6 + $0x1b8] sm:$0xff]  ;;  %v1816_v44 = vpack.c.bf16 %v1078_v41, %v1076_v40 }
 0x4c8   : > { %v414_v40 = vld [vmem:[%s2045_s24 + $0x18] sm:$0x1] }
 0x4c9   : > { %1797 = vmatpush1.bf16.msra.mxu1 %v1796_v50  ;;  %v1087_v50 = vld [vmem:[%s2607_s6 + $0x1d8] sm:$0xff]  ;;  %v1008_v41 = vrot.slane %v414_v40, 1 }
 0x4ca   : > { %1919 = vrot.lane.b32.xlu0 %v1918_v46, %s1961_s29  ;;  %v1063_v46 = vld [vmem:[%s2607_s6 + $0x118] sm:$0xff] }
 0x4cb   : > { %v1798_v54 = vpack.c.bf16 %v1063_v46, %v1061_v45  ;;  %v1818_v45 = vpack.c.bf16 %v1083_v43, %v1081_v42  ;;  %v1080_v46 = vld [vmem:[%s2607_s6 + $0x1a0] sm:$0xff]  ;;  %v1009_v42 = vsel %vm927_vm8, %v931_v4, %v1008_v41  ;;  %v1291_v43 = vld [vmem:[%s2609_s8 + $0x8] sm:$0x1f]  ;;  %v1389_v41 = vld [vmem:[%s2610_s9 + $0x70] sm:$0xff] }
 0x4cc   : > { %v1392_v4 = vld [vmem:[%s2610_s9 + $0x88] sm:$0xff] }
 0x4cd   : > { %1799 = vmatprep.subr.bf16.mxu1 %v1798_v54  ;;  %v1086_v54 = vld [vmem:[%s2607_s6 + $0x1d0] sm:$0xff] }
 0x4ce   : > { %935 = vrot.lane.b32.xlu0 %v932_v48, %s1960_s28  ;;  %v1093_v48 = vld [vmem:[%s2607_s6 + $0x208] sm:$0xff] }
 0x4cf   : > { %v1830_v51 = vpack.c.bf16 %v1095_v49, %v1093_v48  ;;  %v1082_v48 = vld [vmem:[%s2607_s6 + $0x1b0] sm:$0xff]  ;;  %v1085_v49 = vld [vmem:[%s2607_s6 + $0x1c8] sm:$0xff] }
 0x4d0   : > { %v1822_v52 = vpack.c.bf16 %v1087_v50, %v1085_v49 }
 0x4d1   : > { %1831 = vmatprep.subr.bf16.mxu0 %v1830_v51  ;;  %v1820_v51 = vpack.c.bf16 %v1082_v48, %v1080_v46 }
 0x4d2   : > { %979 = vrot.lane.b32.xlu0 %v976_v55, %s1960_s28  ;;  %v1060_v55 = vld [vmem:[%s2607_s6 + $0x100] sm:$0xff]  ;;  %1833 = vmatpush1.bf16.msra.mxu0 %v1832_v57  ;;  %v1824_v57 = vpack.c.bf16 %v1086_v54, %v1084_v53  ;;  %v1393_v53 = vld [vmem:[%s2610_s9 + $0x90] sm:$0xff] }
 0x4d3   : > { %v1800_v2 = vpack.c.bf16 %v1062_v56, %v1060_v55  ;;  %1835 = vmatprep.subr.bf16.mxu0 %v1834_v62  ;;  %v1089_v55 = vld [vmem:[%s2607_s6 + $0x1e8] sm:$0xff]  ;;  %v1091_v56 = vld [vmem:[%s2607_s6 + $0x1f8] sm:$0xff] }
 0x4d4   : > { %v1826_v58 = vpack.c.bf16 %v1091_v56, %v1089_v55 }
 0x4d5   : > { %1801 = vmatpush1.bf16.msra.mxu1 %v1800_v2 }
 0x4d6   : > { %1929 = vrot.lane.b32.xlu0 %v1928_v9, %s1961_s29  ;;  %v1103_v9 = vld [vmem:[%s2607_s6 + $0x258] sm:$0xff]  ;;  %1837 = vmatpush1.bf16.msra.mxu0 %v1836_v6  ;;  %v1915_v6 = vpop.permute.xlu1 %1914 }
 0x4d7   : > { %v1838_v13 = vpack.c.bf16 %v1103_v9, %v1101_v8  ;;  %1803 = vmatprep.subr.bf16.mxu1 %v1802_v10  ;;  %v1917_v10 = vunpack.i.h.bf16 %v1915_v6  ;;  %v1916_v11 = vunpack.i.l.bf16 %v1915_v6 }
 0x4d9   : > { %1839 = vmatprep.subr.bf16.mxu0 %v1838_v13  ;;  %1805 = vmatpush1.bf16.msra.mxu1 %v1804_v22  ;;  %v967_v22 = vrot.slane %v2145_v21, 4 }
 0x4da   : > { %1841 = vmatpush1.bf16.msra.mxu0 %v1840_v18  ;;  %1807 = vmatprep.subr.bf16.mxu1 %v1806_v25  ;;  %v1925_v25 = vpop.permute.xlu1 %1924 }
 0x4db   : > { %1843 = vmatprep.subr.bf16.mxu0 %v1842_v23  ;;  %v968_v26 = vsel %vm963_vm12, %v965_v63, %v967_v22  ;;  %v1399_v22 = vld [vmem:[%s2610_s9 + $0xc0] sm:$0xff] }
 0x4dd   : > { %1809 = vmatpush1.bf16.msra.mxu1 %v1808_v32  ;;  %v1926_v32 = vunpack.i.l.bf16 %v1925_v25 }
 0x4de   : > { %1845 = vmatpush1.bf16.msra.mxu0 %v1844_v31  ;;  %1811 = vmatprep.subr.bf16.mxu1 %v1810_v27  ;;  %v1927_v31 = vunpack.i.h.bf16 %v1925_v25 }
 0x4df   : > { %1642 = vmatprep.subr.msk.mxu0 %vm951_vm10, %v1291_v43 }
 0x4e1   : > { %1813 = vmatpush1.bf16.msra.mxu1 %v1812_v38 }
 0x4e2   : > { %1815 = vmatprep.subr.bf16.mxu1 %v1814_v39 }
 0x4e5   : > { %1817 = vmatpush1.bf16.msra.mxu1 %v1816_v44  ;;  %v1290_v44 = vld [vmem:[%s2609_s8] sm:$0x1f] }
 0x4e6   : > { %1819 = vmatprep.subr.bf16.mxu1 %v1818_v45  ;;  %v1391_v45 = vld [vmem:[%s2610_s9 + $0x80] sm:$0xff] }
 0x4e7   : > { %v1846_v46 = vpack.c.bf16 %v1392_v4, %v1391_v45  ;;  %v1270_v4 = vld [vmem:[%s2608_s7 + $0x10] sm:$0xff] }
 0x4e9   : > { %1821 = vmatpush1.bf16.msra.mxu1 %v1820_v51  ;;  %v1375_v51 = vld [vmem:[%s2610_s9] sm:$0xff] }
 0x4ea   : > { %1823 = vmatprep.subr.bf16.mxu1 %v1822_v52  ;;  %v1376_v52 = vld [vmem:[%s2610_s9 + $0x8] sm:$0xff] }
 0x4eb   : > { %v1848_v55 = vpack.c.bf16 %v1376_v52, %v1375_v51 }
 0x4ed   : > { %1825 = vmatpush1.bf16.msra.mxu1 %v1824_v57 }
 0x4ee   : > { %1827 = vmatprep.subr.bf16.mxu1 %v1826_v58  ;;  %v1377_v58 = vld [vmem:[%s2610_s9 + $0x10] sm:$0xff] }
 0x4f1   : > { %1829 = vmatpush1.bf16.msra.mxu1 %v1828_v61  ;;  %v1396_v61 = vld [vmem:[%s2610_s9 + $0xa8] sm:$0xff] }
 0x4f2   : > { %v1854_v63 = vpack.c.bf16 %v1396_v61, %v1395_v60 }
 0x53d   : > { %v915_v62 = vpop.xlane.xlu0 %914 }
 0x53e   : > { %v916_v2 = vsub.f32 %v2152_v30, %v915_v62  ;;  %v1852_v62 = vpack.c.bf16 %v1378_v59, %v1377_v58 }
 0x540   : > { %v917_v8 = vmul.f32 1.442695, %v916_v2 }
 0x541   : > { %v1910_v9 = vpop.permute.xlu0 %1909 }
 0x542   : > { %1937 = vpow2.f32 %v917_v8  ;;  %v1912_v13 = vunpack.i.h.bf16 %v1910_v9  ;;  %v1911_v14 = vunpack.i.l.bf16 %v1910_v9 }
 0x544   : > { %v1013_v15 = vsel %vm425_vm0, %v2048_v5, %v1912_v13  ;;  %v1021_v16 = vsel %vm425_vm0, %v966_v12, %v1911_v14  ;;  %v1379_v13 = vld [vmem:[%s2610_s9 + $0x20] sm:$0xff]  ;;  %v1380_v14 = vld [vmem:[%s2610_s9 + $0x28] sm:$0xff] }
 0x545   : > { %v1920_v17 = vpop.permute.xlu0 %1919  ;;  %v1023_v30 = vsel %vm1015_vm13, %v1021_v16, %v1916_v11  ;;  %v1016_v18 = vsel %vm1015_vm13, %v1013_v15, %v1917_v10  ;;  %v1856_v15 = vpack.c.bf16 %v1380_v14, %v1379_v13  ;;  %v1397_v16 = vld [vmem:[%s2610_s9 + $0xb0] sm:$0xff] }
 0x546   : > { %v1922_v19 = vunpack.i.h.bf16 %v1920_v17  ;;  %v1921_v20 = vunpack.i.l.bf16 %v1920_v17  ;;  %v1398_v17 = vld [vmem:[%s2610_s9 + $0xb8] sm:$0xff] }
 0x548   : > { %v1025_v23 = vsel %vm1018_vm14, %v1023_v30, %v1921_v20  ;;  %v1019_v24 = vsel %vm1018_vm14, %v1016_v18, %v1922_v19  ;;  %v1858_v30 = vpack.c.bf16 %v1398_v17, %v1397_v16  ;;  %v1381_v18 = vld [vmem:[%s2610_s9 + $0x30] sm:$0xff]  ;;  %v1382_v19 = vld [vmem:[%s2610_s9 + $0x38] sm:$0xff] }
 0x549   : > { %v936_v0 = vpop.permute.xlu0 %935  ;;  %1178 = vmatprep.mubr.f32.mxu1 %v1025_v23  ;;  %v1860_v20 = vpack.c.bf16 %v1382_v19, %v1381_v18  ;;  %v1400_v23 = vld [vmem:[%s2610_s9 + $0xc8] sm:$0xff]  ;;  %v1481_v17 = vld [vmem:[%s2611_s10 + $0x10] sm:$0xff]  ;;  %v1407_v19 = vld [vmem:[%s2610_s9 + $0x100] sm:$0x1] }
 0x54a   : > { %v1014_v5 = vsel %vm425_vm0, %v2052_v7, %v936_v0  ;;  %1179 = vmatmul.mubr.f32.vlgmr.msra.gmra.mrb[2].mxu1 %v1019_v24  ;;  %v1862_v24 = vpack.c.bf16 %v1400_v23, %v1399_v22  ;;  %v1383_v0 = vld [vmem:[%s2610_s9 + $0x40] sm:$0xff] }
 0x54b   : > { %1640 = vmatmul.mubr.msk.f32.vlgmr.msra.gmra.mrb[4].mxu0 %vm1015_vm13, %v1014_v5  ;;  %v1017_v34 = vsel %vm1015_vm13, %v1014_v5, %v1927_v31  ;;  %v1384_v5 = vld [vmem:[%s2610_s9 + $0x48] sm:$0xff]  ;;  %v1386_v31 = vld [vmem:[%s2610_s9 + $0x58] sm:$0xff] }
 0x54c   : > { %v1938_v3 = vpop.eup %1937  ;;  %1261 = vmatprep.mubr.f32.mxu0 %v1958_v47  ;;  %1643 = vmatpush1.msk.msra.mxu0 %vm951_vm10, %v1290_v44  ;;  %v1864_v25 = vpack.c.bf16 %v1384_v5, %v1383_v0  ;;  %v1268_v44 = vld [vmem:[%s2608_s7] sm:$0xff] }
 0x54d   : > { %v919_v28 = vsel %vm912_vm7, %v1938_v3, 0.0  ;;  %v980_v29 = vpop.permute.xlu0 %979  ;;  %1847 = vmatprep.subr.bf16.mxu0 %v1846_v46  ;;  %v1269_v46 = vld [vmem:[%s2608_s7 + $0x8] sm:$0xff] }
 0x54e   : > { %920 = vadd.xlane.f32.xlu1 %v919_v28  ;;  %v1022_v27 = vsel %vm425_vm0, %v968_v26, %v980_v29  ;;  %v1401_v26 = vld [vmem:[%s2610_s9 + $0xd0] sm:$0xff] }
 0x54f   : > { %v1024_v7 = vsel %vm1015_vm13, %v1022_v27, %v1926_v32  ;;  %v1385_v29 = vld [vmem:[%s2610_s9 + $0x50] sm:$0xff]  ;;  %v1403_v27 = vld [vmem:[%s2610_s9 + $0xe0] sm:$0xff] }
 0x550   : > { %v1868_v32 = vpack.c.bf16 %v1386_v31, %v1385_v29 }
 0x551   : > { %v1930_v33 = vpop.permute.xlu0 %1929 }
 0x552   : > { %v1932_v35 = vunpack.i.h.bf16 %v1930_v33  ;;  %v1931_v36 = vunpack.i.l.bf16 %v1930_v33  ;;  %v1404_v33 = vld [vmem:[%s2610_s9 + $0xe8] sm:$0xff] }
 0x554   : > { %v1026_v38 = vsel %vm1018_vm14, %v1024_v7, %v1931_v36  ;;  %v1020_v39 = vsel %vm1018_vm14, %v1017_v34, %v1932_v35  ;;  %v1870_v7 = vpack.c.bf16 %v1404_v33, %v1403_v27  ;;  %v1387_v34 = vld [vmem:[%s2610_s9 + $0x60] sm:$0xff]  ;;  %v1388_v35 = vld [vmem:[%s2610_s9 + $0x68] sm:$0xff] }
 0x555   : > { %1184 = vmatprep.mubr.f32.mxu1 %v1026_v38  ;;  %v1872_v36 = vpack.c.bf16 %v1388_v35, %v1387_v34  ;;  %v1405_v38 = vld [vmem:[%s2610_s9 + $0xf0] sm:$0xff] }
 0x556   : > { %1185 = vmatmul.mubr.f32.gmra.mrb[4].mxu1 %v1020_v39  ;;  %v1406_v39 = vld [vmem:[%s2610_s9 + $0xf8] sm:$0xff] }
 0x557   : > { %v1874_v40 = vpack.c.bf16 %v1406_v39, %v1405_v38 }
 0x55f   : > { %1010 = vrot.lane.b32.xlu1 %v1009_v42, %s1960_s28  ;;  %v1390_v42 = vld [vmem:[%s2610_s9 + $0x78] sm:$0xff] }
 0x560   : > { %v1876_v43 = vpack.c.bf16 %v1390_v42, %v1389_v41 }
 0x5db   : > { %v921_v48 = vpop.xlane.xlu1 %920 }
 0x5dc   : > { %1939 = vrcp.f32 %v921_v48 }
 0x5df   : > { %v1011_v49 = vpop.permute.xlu1 %1010 }
 0x5e0   : > { %v1027_v50 = vsel %vm425_vm0, %v2145_v21, %v1011_v49  ;;  %v1394_v21 = vld [vmem:[%s2610_s9 + $0x98] sm:$0xff] }
 0x5e1   : > { %1641 = vmatmul.mubr.msk.f32.gmra.mrb[6].mxu0 %vm1015_vm13, %v1027_v50  ;;  %v1850_v57 = vpack.c.bf16 %v1394_v21, %v1393_v53  ;;  %v1271_v50 = vld [vmem:[%s2608_s7 + $0x18] sm:$0xff] }
 0x5e2   : > { %1366 = vmatprep.mubr.f32.mxu0 %v1958_v47 }
 0x5e6   : > { %v1940_v54 = vpop.eup %1939 }
 0x5e7   : > { %v923_v56 = vmul.f32 %v1940_v54, %v1938_v3  ;;  %v1402_v3 = vld [vmem:[%s2610_s9 + $0xd8] sm:$0xff] }
 0x5e8   : > { %v1866_v28 = vpack.c.bf16 %v1402_v3, %v1401_v26 }
 0x5e9   : > { %1644 = vmatmul.mubr.msk.f32.vlgmr.msra.gmra.mrb[8].mxu0 %vm1292_vm15, %v923_v56 }
 0x5ea   : > { %1849 = vmatpush3.bf16.msra.mxu0 %v1848_v55 }
 0x5eb   : > { %1851 = vmatprep.subr.bf16.mxu0 %v1850_v57 }
 0x5ee   : > { %1853 = vmatpush3.bf16.msra.mxu0 %v1852_v62 }
 0x5ef   : > { %1855 = vmatprep.subr.bf16.mxu0 %v1854_v63 }
 0x5f2   : > { %1857 = vmatpush3.bf16.msra.mxu0 %v1856_v15  ;;  %v1480_v15 = vld [vmem:[%s2611_s10 + $0x8] sm:$0xff] }
 0x5f3   : > { %1859 = vmatprep.subr.bf16.mxu0 %v1858_v30 }
 0x5f6   : > { %1861 = vmatpush3.bf16.msra.mxu0 %v1860_v20 }
 0x5f7   : > { %1863 = vmatprep.subr.bf16.mxu0 %v1862_v24  ;;  %v1483_v24 = vld [vmem:[%s2611_s10 + $0x20] sm:$0x1] }
 0x5fa   : > { %1865 = vmatpush3.bf16.msra.mxu0 %v1864_v25 }
 0x5fb   : > { %1867 = vmatprep.subr.bf16.mxu0 %v1866_v28 }
 0x5fe   : > { %1869 = vmatpush3.bf16.msra.mxu0 %v1868_v32 }
 0x5ff   : > { %1871 = vmatprep.subr.bf16.mxu0 %v1870_v7 }
 0x602   : > { %1873 = vmatpush3.bf16.msra.mxu0 %v1872_v36 }
 0x603   : > { %1875 = vmatprep.subr.bf16.mxu0 %v1874_v40 }
 0x606   : > { %1877 = vmatpush3.bf16.msra.mxu0 %v1876_v43 }
 0x607   : > { %1878 = vmatprep.subr.bf16.mxu0 %v1956_v37 }
 0x61d   : > { %v1180_v1 = vpop.f32.mrb[2].mxu1 }
 0x61e   : > { %v1257_v2 = vpop.f32.mrb[4].mxu0  ;;  %v1182_v6 = vpop.f32.mrb[3].mxu1 }
 0x61f   : > { %v1258_v8 = vadd.f32 %v1257_v2, %v1180_v1  ;;  %v1259_v9 = vpop.f32.mrb[5].mxu0 }
 0x620   : > { %v1260_v10 = vadd.f32 %v1259_v9, %v1182_v6 }
 0x621   : > { %v1272_v52 = vadd.f32 %v1268_v44, %v1258_v8 }
 0x622   : > { %v1273_v21 = vadd.f32 %v1269_v46, %v1260_v10  ;;  %v1479_v10 = vld [vmem:[%s2611_s10] sm:$0xff] }
 0x623   : > { %v1879_v16 = vpack.c.bf16 %v1480_v15, %v1479_v10 }
 0x629   : > { %v1186_v11 = vpop.f32.mrb[4].mxu1 }
 0x62a   : > { %v1188_v12 = vpop.f32.mrb[5].mxu1 }
 0x6b4   : > { %v1263_v45 = vpop.f32.mrb[6].mxu0 }
 0x6b5   : > { %v1264_v48 = vadd.f32 %v1263_v45, %v1186_v11  ;;  %v1265_v49 = vpop.f32.mrb[7].mxu0 }
 0x6b6   : > { %v1266_v51 = vadd.f32 %v1265_v49, %v1188_v12 }
 0x6b7   : > { %v1274_v53 = vadd.f32 %v1270_v4, %v1264_v48 }
 0x6b8   : > { %v1275_v54 = vadd.f32 %v1271_v50, %v1266_v51 }
 0x6b9   : > { %v1276_v55 = vmax.f32 %v1272_v52, %v1274_v53 }
 0x6ba   : > { %v1283_v56 = vmax.f32 %v1273_v21, %v1275_v54 }
 0x6bb   : > { %v1277_v57 = vrot.slane %v1276_v55, 4 }
 0x6bc   : > { %v1284_v58 = vrot.slane %v1283_v56, 4  ;;  %v1368_v59 = vpop.f32.mrb[8].mxu0 }
 0x6bd   : > { %v1278_v60 = vmax.f32 %v1276_v55, %v1277_v57  ;;  %v1370_v61 = vpop.f32.mrb[9].mxu0 }
 0x6be   : > { %v1285_v62 = vmax.f32 %v1283_v56, %v1284_v58 }
 0x6bf   : > { %v1279_v63 = vrot.slane %v1278_v60, 2 }
 0x6c0   : > { %v1286_v1 = vrot.slane %v1285_v62, 2 }
 0x6c1   : > { %v1280_v2 = vmax.f32 %v1278_v60, %v1279_v63 }
 0x6c2   : > { %v1287_v6 = vmax.f32 %v1285_v62, %v1286_v1 }
 0x6c3   : > { %v1281_v9 = vrot.slane %v1280_v2, 1 }
 0x6c4   : > { %v1288_v11 = vrot.slane %v1287_v6, 1 }
 0x6c5   : > { %v1282_v13 = vmax.f32 %v1280_v2, %v1281_v9 }
 0x6c6   : > { %v1289_v12 = vmax.f32 %v1287_v6, %v1288_v11 }
 0x6c7   : > { %v1373_v8 = vmul.f32 %v1368_v59, %v1282_v13 }
 0x6c8   : > { %v1374_v14 = vmul.f32 %v1370_v61, %v1289_v12 }
 0x6ca   : > { %1472 = vmatprep.mubr.f32.mxu0 %v1374_v14 }
 0x6cb   : > { %1473 = vmatmul.mubr.f32.vlgmr.msra.gmra.mrb[10].mxu0 %v1373_v8 }
 0x6cc   : > { %1745 = vmatprep.mubr.msk.f32.mxu0 %vm1957_vm4, %v1958_v47  ;;  %1880 = vmatpush3.bf16.msra.mxu0 %v1879_v16  ;;  %v1482_v47 = vld [vmem:[%s2611_s10 + $0x18] sm:$0xff] }
 0x6cd   : > { %1881 = vmatprep.subr.bf16.mxu0 %v1956_v37  ;;  %v1882_v30 = vpack.c.bf16 %v1482_v47, %v1481_v17 }
 0x6d0   : > { %1883 = vmatpush3.bf16.msra.mxu0 %v1882_v30 }
 0x79e   : > { %v1696_v18 = vpop.f32.mrb[10].mxu0 }
 0x79f   : > { %v1697_v20 = vpop.f32.mrb[11].mxu0 }
 0x7a0   : > { %v1698_v22 = vadd.f32 %v1697_v20, %v1696_v18 }
 0x7a2   : > { %v1475_v23 = vadd.f32 %v1698_v22, %v1407_v19 }
 0x7a4   : > { %v1478_v37 = vmax.f32 %v1475_v23, 0.0 }
 0x7a6   : > { %1746 = vmatmul.mubr.msk.f32.vlgmr.msra.gmra.mrb[12].mxu0 %vm425_vm0, %v1478_v37 }
 0x879   : > { %v1553_v0 = vpop.f32.mrb[12].mxu0 }
 0x87a   : > { %v1554_v5 = vadd.f32 %v1553_v0, %v1483_v24  ;;  %v1747_v25 = vpop.f32.mrb[13].mxu0 }
 0x87c   : > { %v1557_v26 = vsub.f32 0.0, %v1554_v5 }
 0x87e   : > { %v1558_v3 = vmul.f32 1.442695, %v1557_v26 }
 0x880   : > { %1941 = vpow2.f32 %v1558_v3 }
 0x88a   : > { %v1942_v28 = vpop.eup %1941 }
 0x88b   : > { %v1560_v29 = vadd.f32 1.0, %v1942_v28 }
 0x88d   : > { %1943 = vrcp.f32 %v1560_v29 }
 0x897   : > { %v1944_v31 = vpop.eup %1943 }
 0x898   : > { %1564 = vst.msk [vmem:[%s410_s12] sm:$0x1] %vm1563_vm1, %v1944_v31 }
 0x899 PF: > { %s21_s17 = sadd.s32 1, %s1951_s17  }
 0x89a   : > { %p18_p4 = scmp.ge.s32.totalorder %s21_s17, 4  }
 0x89c   :  { %20 = sbr.rel (!%p18_p4) target bundleno = 1 (0x1), region = 100 }

</bundles_post_ra>
